<compile_context>
chip_gen: v7x
topology: tpu7x:2x2x1
jax: 0.10.0
libtpu: 0.0.40
codegen_flags: <defaults>
</compile_context>

<pallas_src>
import math
import functools

import jax
import jax.numpy as jnp
from jax import lax
from jax.experimental import pallas as pl
from jax.experimental.pallas import tpu as pltpu


def _layernorm(v, g, b, eps=1e-5):
    mu = jnp.mean(v, axis=-1, keepdims=True)
    var = jnp.mean((v - mu) ** 2, axis=-1, keepdims=True)
    return (v - mu) * lax.rsqrt(var + eps) * g + b


def _gelu_tanh(x):
    c = jnp.float32(0.7978845608028654)  # sqrt(2/pi)
    return 0.5 * x * (1.0 + jnp.tanh(c * (x + jnp.float32(0.044715) * x * x * x)))


def encoder_block_kernel(xq_ref, xf_ref, mask_ref,
                         ln1g_ref, ln1b_ref, wqkv_ref, wo_ref,
                         ln2g_ref, ln2b_ref, w1_ref, b1_ref, w2_ref, b2_ref,
                         o_ref,
                         q_scr, k_scr, v_scr,
                         *, n_heads, ffn_chunk):
    f32 = jnp.float32
    cdt = wqkv_ref.dtype                 # matmul compute/storage dtype (bf16)

    tq = xq_ref.shape[1]
    T = xf_ref.shape[1]
    D = xq_ref.shape[2]
    H = n_heads
    hd = D // H
    scale = f32(1.0 / math.sqrt(hd))

    # ---- once per batch element: LN1 over the full sequence + Q/K/V projections,
    # written head-major into persistent VMEM scratch (reused by every query tile).
    @pl.when(pl.program_id(1) == 0)
    def _fill_qkv_cache():
        xf = xf_ref[0].astype(f32)                                     # (T, D)
        gamma1 = ln1g_ref[...].astype(f32)
        beta1 = ln1b_ref[...].astype(f32)
        hf = _layernorm(xf, gamma1, beta1).astype(cdt)
        # full-width (D-contraction) matmuls at full MXU cadence; 1/sqrt(hd) folded into Q
        q_all = (jnp.dot(hf, wqkv_ref[:, 0:D], preferred_element_type=f32) * scale).astype(cdt)
        k_all = jnp.dot(hf, wqkv_ref[:, D:2 * D], preferred_element_type=f32).astype(cdt)
        v_all = jnp.dot(hf, wqkv_ref[:, 2 * D:3 * D], preferred_element_type=f32).astype(cdt)
        for h in range(H):                 # one-time lane-slice copies into head-major scratch
            sl = slice(h * hd, (h + 1) * hd)
            q_scr[h] = q_all[:, sl]
            k_scr[h] = k_all[:, sl]
            v_scr[h] = v_all[:, sl]

    # ---------------- self-attention for this query tile (pre-LN) ----------------
    x_q = xq_ref[0].astype(f32)                                        # (tq, D) residual stream
    mask = mask_ref[0].astype(f32)                                     # (1, T) 1 = attend
    mask_bias = jnp.where(mask > 0.0, f32(0.0), f32(-1e9))             # computed once per tile

    qs = pl.multiple_of(pl.program_id(1) * tq, tq)
    q_h = q_scr[:, pl.ds(qs, tq), :]                                   # (H, tq, hd)
    k_h = k_scr[...]                                                   # (H, T, hd)
    v_h = v_scr[...]                                                   # (H, T, hd)

    s = jnp.einsum('hqd,hkd->hqk', q_h, k_h, preferred_element_type=f32)   # (H, tq, T)
    s = s + mask_bias
    s = s - jnp.max(s, axis=-1, keepdims=True)
    p = jnp.exp(s)                                                     # unnormalized, <= 1
    inv_l = pl.reciprocal(jnp.sum(p, axis=-1, keepdims=True), approx=True)  # (H, tq, 1)
    ctx = jnp.einsum('hqk,hkd->hqd', p.astype(cdt), v_h, preferred_element_type=f32)
    ctx = ctx * inv_l                                                  # normalize after PV
    # output projection, batched over heads then reduced (avoids concat / transposes)
    y = jnp.einsum('hqd,hde->hqe', ctx.astype(cdt), wo_ref[...], preferred_element_type=f32)
    y = jnp.sum(y, axis=0)                                             # (tq, D)
    x1 = x_q + y

    # ---------------- feed-forward (pre-LN), hidden dim chunked ----------------
    h2 = _layernorm(x1, ln2g_ref[...].astype(f32), ln2b_ref[...].astype(f32)).astype(cdt)
    dff = w1_ref.shape[1]                    # 4 * D
    ff = jnp.zeros((tq, D), f32)
    for c in range(dff // ffn_chunk):
        csl = slice(c * ffn_chunk, (c + 1) * ffn_chunk)
        g = jnp.dot(h2, w1_ref[:, csl], preferred_element_type=f32) + b1_ref[:, csl].astype(f32)
        g = _gelu_tanh(g).astype(cdt)
        ff = ff + jnp.dot(g, w2_ref[csl, :], preferred_element_type=f32)
    ff = ff + b2_ref[...].astype(f32)
    x2 = x1 + ff

    o_ref[0] = x2.astype(o_ref.dtype)


def _pick_tq(T):
    # Cap query tile at 256: keeps the (H, tq, T) score tile + K/V cache within v7x's 64 MiB
    # VMEM (v6e could go to 512; see flash-loop TODO for long T).
    if T <= 256:
        return T
    for cand in (256, 128, 64, 32, 16, 8):
        if T % cand == 0:
            return cand
    return T


def _pick_ffn_chunk(dff):
    # Largest divisor of dff <= 1024 (prefer 512-multiples) so the (tq, chunk) f32 GELU
    # intermediate stays bounded while the W2 contraction stays MXU-sized.
    if dff <= 1024:
        return dff
    for cand in (1024, 896, 768, 640, 512, 384, 256, 128):
        if dff % cand == 0:
            return cand
    return dff


def _vmem_limit_bytes(T, D, tq):
    bf = 2
    weights = 12 * D * D * bf                       # Wqkv + Wo + W1 + W2 (bf16)
    small = 12 * D * 4                              # LN params + FFN biases (f32)
    scratch = 3 * T * D * bf                        # head-major Q/K/V cache
    acts = (2 * tq * D + T * D + 2 * T) * bf        # x tile in/out + full-seq block + mask
    est = 2 * weights + small + scratch + 2 * acts + (8 << 20)   # worst case + margin
    try:
        phys = getattr(pltpu.get_tpu_info(), "vmem_capacity_bytes", 128 << 20)
    except Exception:
        phys = 128 << 20
    cap = int(phys * 0.75)                          # leave compiler headroom (48 MiB on v7x)
    return int(min(max(est, 32 << 20), cap))


def _const_spec(shape, single_buffer):
    zeros = (0,) * len(shape)
    idx = lambda b, qi, zeros=zeros: zeros
    if single_buffer:
        # Weight block index never changes -> one VMEM copy is enough (halves weight footprint)
        return pl.BlockSpec(shape, idx, pipeline_mode=pl.Buffered(1))
    return pl.BlockSpec(shape, idx)


@functools.lru_cache(maxsize=None)
def _build_encoder_block_call(B, T, D, tq, n_heads, act_dtype, w_dtype, single_buffer):
    H = n_heads
    hd = D // H
    ffn_chunk = _pick_ffn_chunk(4 * D)
    kernel = functools.partial(encoder_block_kernel, n_heads=n_heads, ffn_chunk=ffn_chunk)
    ws = lambda shape: _const_spec(shape, single_buffer)

    grid_spec = pltpu.PrefetchScalarGridSpec(
        num_scalar_prefetch=0,
        grid=(B, T // tq),
        in_specs=[
            pl.BlockSpec((1, tq, D), lambda b, qi: (b, qi, 0)),   # x: query-row tile (residual)
            pl.BlockSpec((1, T, D), lambda b, qi: (b, 0, 0)),     # x: full sequence (K/V source)
            pl.BlockSpec((1, 1, T), lambda b, qi: (b, 0, 0)),     # key-padding mask
            ws((1, D)), ws((1, D)),                               # ln1 gamma / beta
            ws((D, 3 * D)),                                       # W_qkv
            ws((H, hd, D)),                                       # W_out, head-major
            ws((1, D)), ws((1, D)),                               # ln2 gamma / beta
            ws((D, 4 * D)), ws((1, 4 * D)),                       # FFN W1 / b1
            ws((4 * D, D)), ws((1, D)),                           # FFN W2 / b2
        ],
        out_specs=pl.BlockSpec((1, tq, D), lambda b, qi: (b, qi, 0)),
        scratch_shapes=[
            pltpu.VMEM((H, T, hd), w_dtype),                      # Q cache (scale folded in)
            pltpu.VMEM((H, T, hd), w_dtype),                      # K cache
            pltpu.VMEM((H, T, hd), w_dtype),                      # V cache
        ],
    )
    return pl.pallas_call(
        kernel,
        out_shape=jax.ShapeDtypeStruct((B, T, D), act_dtype),
        grid_spec=grid_spec,
        compiler_params=pltpu.CompilerParams(
            # B parallel (megacore shards batches; cache stays core-local), qi arbitrary
            # (sequential, so the qi==0 cache fill is visible to later tiles).
            dimension_semantics=("parallel", "arbitrary"),
            vmem_limit_bytes=_vmem_limit_bytes(T, D, tq),
        ),
    )


_SINGLE_BUFFER_WEIGHTS = None  # detected on first call: does this jax accept pl.Buffered(1)?


def encoder_block(x, src_mask3, params, *, n_heads):
    global _SINGLE_BUFFER_WEIGHTS
    B, T, D = x.shape
    tq = _pick_tq(T)
    hd = D // n_heads
    wo_heads = params["w_out"].reshape(n_heads, hd, D)   # head-major out-projection (free view)
    args = (x, x, src_mask3,
            params["ln1_g"], params["ln1_b"], params["w_qkv"], wo_heads,
            params["ln2_g"], params["ln2_b"], params["w1"], params["b1"],
            params["w2"], params["b2"])
    w_dtype = params["w_qkv"].dtype

    def run(single_buffer):
        fn = _build_encoder_block_call(B, T, D, tq, n_heads, x.dtype, w_dtype, single_buffer)
        return fn(*args)

    if _SINGLE_BUFFER_WEIGHTS is None:
        try:
            out = run(True)
            _SINGLE_BUFFER_WEIGHTS = True
            return out
        except Exception:  # pl.Buffered(1) not supported on this jax build -> default specs
            _SINGLE_BUFFER_WEIGHTS = False
    return run(_SINGLE_BUFFER_WEIGHTS)


def transformer_encoder(x, src_mask, block_params, *, n_heads):
    # src_mask: (B, T), 1 = attend, 0 = masked key -> (B, 1, T) f32 for the kernel.
    orig_dtype = x.dtype
    m = src_mask.reshape(src_mask.shape[0], 1, src_mask.shape[1]).astype(jnp.float32)
    x = x.astype(jnp.bfloat16)  # carry activations bf16 between blocks (halves HBM traffic)
    for params in block_params:
        x = encoder_block(x, m, params, n_heads=n_heads)
    return x.astype(orig_dtype)


def init_block_params(key, emb_dim, param_dtype=jnp.bfloat16):
    ks = jax.random.split(key, 6)
    s = 0.02
    return {
        "ln1_g": jnp.ones((1, emb_dim), jnp.float32),
        "ln1_b": jnp.zeros((1, emb_dim), jnp.float32),
        # attention linears use bias=False (the block's default); weights stored (in, out), bf16
        "w_qkv": (s * jax.random.normal(ks[0], (emb_dim, 3 * emb_dim))).astype(param_dtype),
        "w_out": (s * jax.random.normal(ks[1], (emb_dim, emb_dim))).astype(param_dtype),
        "ln2_g": jnp.ones((1, emb_dim), jnp.float32),
        "ln2_b": jnp.zeros((1, emb_dim), jnp.float32),
        # FFN linears (nn.Linear default has bias); biases kept in f32
        "w1": (s * jax.random.normal(ks[2], (emb_dim, 4 * emb_dim))).astype(param_dtype),
        "b1": (s * jax.random.normal(ks[3], (1, 4 * emb_dim))).astype(jnp.float32),
        "w2": (s * jax.random.normal(ks[4], (4 * emb_dim, emb_dim))).astype(param_dtype),
        "b2": (s * jax.random.normal(ks[5], (1, emb_dim))).astype(jnp.float32),
    }


if __name__ == "__main__":
    # NOTE: demo shapes are intentionally tiny; real deployments should use D (and head_dim)
    # as multiples of 128 for lane-dense stores and full MXU utilization.
    B, T, D = 2, 8, 32
    n_heads = 4
    n_blocks = 2

    root = jax.random.PRNGKey(0)
    kx, kp = jax.random.split(root)
    x = jax.random.normal(kx, (B, T, D), jnp.float32)

    # mask: attend everywhere except the last two key positions of batch element 1
    src_mask = jnp.ones((B, T), jnp.float32)
    src_mask = src_mask.at[1, -2:].set(0.0)

    block_keys = jax.random.split(kp, n_blocks)
    block_params = [init_block_params(k, D) for k in block_keys]

    out = transformer_encoder(x, src_mask, block_params, n_heads=n_heads)
    out = jax.block_until_ready(out)
    assert out.shape == (B, T, D) and bool(jnp.all(jnp.isfinite(out)))
    print("KERNEL_OK")
</pallas_src>

<mosaic_0001>
module attributes {stable_mosaic.version = 11 : i64} {
  func.func @encoder_block_kernel(%arg0: i32, %arg1: i32, %arg2: memref<1x8x32xbf16, #tpu.memory_space<vmem>>, %arg3: memref<1x8x32xbf16, #tpu.memory_space<vmem>>, %arg4: memref<1x1x8xf32, #tpu.memory_space<vmem>>, %arg5: memref<1x32xf32, #tpu.memory_space<vmem>>, %arg6: memref<1x32xf32, #tpu.memory_space<vmem>>, %arg7: memref<32x96xbf16, #tpu.memory_space<vmem>>, %arg8: memref<4x8x32xbf16, #tpu.memory_space<vmem>>, %arg9: memref<1x32xf32, #tpu.memory_space<vmem>>, %arg10: memref<1x32xf32, #tpu.memory_space<vmem>>, %arg11: memref<32x128xbf16, #tpu.memory_space<vmem>>, %arg12: memref<1x128xf32, #tpu.memory_space<vmem>>, %arg13: memref<128x32xbf16, #tpu.memory_space<vmem>>, %arg14: memref<1x32xf32, #tpu.memory_space<vmem>>, %arg15: memref<1x8x32xbf16, #tpu.memory_space<vmem>>, %arg16: memref<4x8x8xbf16, #tpu.memory_space<vmem>>, %arg17: memref<4x8x8xbf16, #tpu.memory_space<vmem>>, %arg18: memref<4x8x8xbf16, #tpu.memory_space<vmem>>) attributes {dimension_semantics = [#tpu.dimension_semantics<parallel>, #tpu.dimension_semantics<arbitrary>], iteration_bounds = array<i64: 2, 1>, scalar_prefetch = 0 : i64, scratch_operands = 3 : i64, tpu.core_type = #tpu.core_type<tc>, window_params = [{transform_indices = @transform_0, window_bounds = array<i64: 1, 8, 32>}, {transform_indices = @transform_1, window_bounds = array<i64: 1, 8, 32>}, {transform_indices = @transform_2, window_bounds = array<i64: 1, 1, 8>}, {pipeline_mode = #tpu.pipeline_mode<synchronous>, transform_indices = @transform_3, window_bounds = array<i64: 1, 32>}, {pipeline_mode = #tpu.pipeline_mode<synchronous>, transform_indices = @transform_4, window_bounds = array<i64: 1, 32>}, {pipeline_mode = #tpu.pipeline_mode<synchronous>, transform_indices = @transform_5, window_bounds = array<i64: 32, 96>}, {pipeline_mode = #tpu.pipeline_mode<synchronous>, transform_indices = @transform_6, window_bounds = array<i64: 4, 8, 32>}, {pipeline_mode = #tpu.pipeline_mode<synchronous>, transform_indices = @transform_7, window_bounds = array<i64: 1, 32>}, {pipeline_mode = #tpu.pipeline_mode<synchronous>, transform_indices = @transform_8, window_bounds = array<i64: 1, 32>}, {pipeline_mode = #tpu.pipeline_mode<synchronous>, transform_indices = @transform_9, window_bounds = array<i64: 32, 128>}, {pipeline_mode = #tpu.pipeline_mode<synchronous>, transform_indices = @transform_10, window_bounds = array<i64: 1, 128>}, {pipeline_mode = #tpu.pipeline_mode<synchronous>, transform_indices = @transform_11, window_bounds = array<i64: 128, 32>}, {pipeline_mode = #tpu.pipeline_mode<synchronous>, transform_indices = @transform_12, window_bounds = array<i64: 1, 32>}, {transform_indices = @transform_13, window_bounds = array<i64: 1, 8, 32>}]} {
    %c0_i32 = arith.constant 0 : i32
    %0 = arith.cmpi eq, %arg1, %c0_i32 : i32
    %1 = arith.extui %0 : i1 to i32
    %cst = arith.constant 0.353553385 : f32
    %c0_i32_0 = arith.constant 0 : i32
    %2 = arith.cmpi ne, %1, %c0_i32_0 : i32
    scf.if %2 {
      %c0_53 = arith.constant 0 : index
      %c0_54 = arith.constant 0 : index
      %c0_55 = arith.constant 0 : index
      %96 = vector.load %arg3[%c0_53, %c0_54, %c0_55] : memref<1x8x32xbf16, #tpu.memory_space<vmem>>, vector<1x8x32xbf16>
      %97 = vector.shape_cast %96 : vector<1x8x32xbf16> to vector<8x32xbf16>
      %98 = arith.extf %97 : vector<8x32xbf16> to vector<8x32xf32>
      %c0_56 = arith.constant 0 : index
      %c0_57 = arith.constant 0 : index
      %99 = vector.load %arg5[%c0_56, %c0_57] : memref<1x32xf32, #tpu.memory_space<vmem>>, vector<1x32xf32>
      %c0_58 = arith.constant 0 : index
      %c0_59 = arith.constant 0 : index
      %100 = vector.load %arg6[%c0_58, %c0_59] : memref<1x32xf32, #tpu.memory_space<vmem>>, vector<1x32xf32>
      %cst_60 = arith.constant dense<0.000000e+00> : vector<8xf32>
      %101 = vector.multi_reduction <add>, %98, %cst_60 [1] : vector<8x32xf32> to vector<8xf32>
      %102 = vector.shape_cast %101 : vector<8xf32> to vector<8x1xf32>
      %cst_61 = arith.constant 3.200000e+01 : f32
      %103 = vector.broadcast %cst_61 : f32 to vector<8x1xf32>
      %104 = arith.divf %102, %103 : vector<8x1xf32>
      %105 = vector.broadcast %104 : vector<8x1xf32> to vector<8x32xf32>
      %106 = arith.subf %98, %105 : vector<8x32xf32>
      %107 = arith.mulf %106, %106 : vector<8x32xf32>
      %cst_62 = arith.constant dense<0.000000e+00> : vector<8xf32>
      %108 = vector.multi_reduction <add>, %107, %cst_62 [1] : vector<8x32xf32> to vector<8xf32>
      %109 = vector.shape_cast %108 : vector<8xf32> to vector<8x1xf32>
      %cst_63 = arith.constant 3.200000e+01 : f32
      %110 = vector.broadcast %cst_63 : f32 to vector<8x1xf32>
      %111 = arith.divf %109, %110 : vector<8x1xf32>
      %112 = vector.broadcast %104 : vector<8x1xf32> to vector<8x32xf32>
      %113 = arith.subf %98, %112 : vector<8x32xf32>
      %cst_64 = arith.constant 9.99999974E-6 : f32
      %114 = vector.broadcast %cst_64 : f32 to vector<8x1xf32>
      %115 = arith.addf %111, %114 : vector<8x1xf32>
      %116 = math.rsqrt %115 : vector<8x1xf32>
      %117 = vector.broadcast %116 : vector<8x1xf32> to vector<8x32xf32>
      %118 = arith.mulf %113, %117 : vector<8x32xf32>
      %119 = vector.broadcast %99 : vector<1x32xf32> to vector<8x32xf32>
      %120 = arith.mulf %118, %119 : vector<8x32xf32>
      %121 = vector.broadcast %100 : vector<1x32xf32> to vector<8x32xf32>
      %122 = arith.addf %120, %121 : vector<8x32xf32>
      %123 = arith.truncf %122 : vector<8x32xf32> to vector<8x32xbf16>
      %c0_65 = arith.constant 0 : index
      %c0_66 = arith.constant 0 : index
      %124 = vector.load %arg7[%c0_65, %c0_66] : memref<32x96xbf16, #tpu.memory_space<vmem>>, vector<32x32xbf16>
      %cst_67 = arith.constant dense<0.000000e+00> : vector<8x32xf32>
      %125 = tpu.matmul %123, %124, %cst_67 {dimension_numbers = #tpu.dot_dimension_numbers<[1], [0], [0], [1], [0, 0, 1, 1], [], []>} : vector<8x32xbf16>, vector<32x32xbf16>, vector<8x32xf32> -> vector<8x32xf32>
      %126 = vector.broadcast %cst : f32 to vector<8x32xf32>
      %127 = arith.mulf %125, %126 : vector<8x32xf32>
      %128 = arith.truncf %127 : vector<8x32xf32> to vector<8x32xbf16>
      %c0_68 = arith.constant 0 : index
      %c32 = arith.constant 32 : index
      %129 = vector.load %arg7[%c0_68, %c32] : memref<32x96xbf16, #tpu.memory_space<vmem>>, vector<32x32xbf16>
      %cst_69 = arith.constant dense<0.000000e+00> : vector<8x32xf32>
      %130 = tpu.matmul %123, %129, %cst_69 {dimension_numbers = #tpu.dot_dimension_numbers<[1], [0], [0], [1], [0, 0, 1, 1], [], []>} : vector<8x32xbf16>, vector<32x32xbf16>, vector<8x32xf32> -> vector<8x32xf32>
      %131 = arith.truncf %130 : vector<8x32xf32> to vector<8x32xbf16>
      %c0_70 = arith.constant 0 : index
      %c64 = arith.constant 64 : index
      %132 = vector.load %arg7[%c0_70, %c64] : memref<32x96xbf16, #tpu.memory_space<vmem>>, vector<32x32xbf16>
      %cst_71 = arith.constant dense<0.000000e+00> : vector<8x32xf32>
      %133 = tpu.matmul %123, %132, %cst_71 {dimension_numbers = #tpu.dot_dimension_numbers<[1], [0], [0], [1], [0, 0, 1, 1], [], []>} : vector<8x32xbf16>, vector<32x32xbf16>, vector<8x32xf32> -> vector<8x32xf32>
      %134 = arith.truncf %133 : vector<8x32xf32> to vector<8x32xbf16>
      %135 = vector.extract_strided_slice %128 {offsets = [0, 0], sizes = [8, 8], strides = [1, 1]} : vector<8x32xbf16> to vector<8x8xbf16>
      %c0_72 = arith.constant 0 : index
      %c0_73 = arith.constant 0 : index
      %c0_74 = arith.constant 0 : index
      %136 = vector.load %arg16[%c0_72, %c0_73, %c0_74] : memref<4x8x8xbf16, #tpu.memory_space<vmem>>, vector<1x8x8xbf16>
      %137 = vector.shape_cast %136 : vector<1x8x8xbf16> to vector<8x8xbf16>
      %138 = vector.shape_cast %135 : vector<8x8xbf16> to vector<1x8x8xbf16>
      tpu.vector_store %arg16[%c0_72, %c0_73, %c0_74], %138 {strides = array<i32>} : memref<4x8x8xbf16, #tpu.memory_space<vmem>>, vector<1x8x8xbf16>,
      %139 = vector.extract_strided_slice %131 {offsets = [0, 0], sizes = [8, 8], strides = [1, 1]} : vector<8x32xbf16> to vector<8x8xbf16>
      %c0_75 = arith.constant 0 : index
      %c0_76 = arith.constant 0 : index
      %c0_77 = arith.constant 0 : index
      %140 = vector.load %arg17[%c0_75, %c0_76, %c0_77] : memref<4x8x8xbf16, #tpu.memory_space<vmem>>, vector<1x8x8xbf16>
      %141 = vector.shape_cast %140 : vector<1x8x8xbf16> to vector<8x8xbf16>
      %142 = vector.shape_cast %139 : vector<8x8xbf16> to vector<1x8x8xbf16>
      tpu.vector_store %arg17[%c0_75, %c0_76, %c0_77], %142 {strides = array<i32>} : memref<4x8x8xbf16, #tpu.memory_space<vmem>>, vector<1x8x8xbf16>,
      %143 = vector.extract_strided_slice %134 {offsets = [0, 0], sizes = [8, 8], strides = [1, 1]} : vector<8x32xbf16> to vector<8x8xbf16>
      %c0_78 = arith.constant 0 : index
      %c0_79 = arith.constant 0 : index
      %c0_80 = arith.constant 0 : index
      %144 = vector.load %arg18[%c0_78, %c0_79, %c0_80] : memref<4x8x8xbf16, #tpu.memory_space<vmem>>, vector<1x8x8xbf16>
      %145 = vector.shape_cast %144 : vector<1x8x8xbf16> to vector<8x8xbf16>
      %146 = vector.shape_cast %143 : vector<8x8xbf16> to vector<1x8x8xbf16>
      tpu.vector_store %arg18[%c0_78, %c0_79, %c0_80], %146 {strides = array<i32>} : memref<4x8x8xbf16, #tpu.memory_space<vmem>>, vector<1x8x8xbf16>,
      %147 = vector.extract_strided_slice %128 {offsets = [0, 8], sizes = [8, 8], strides = [1, 1]} : vector<8x32xbf16> to vector<8x8xbf16>
      %c1 = arith.constant 1 : index
      %c0_81 = arith.constant 0 : index
      %c0_82 = arith.constant 0 : index
      %148 = vector.load %arg16[%c1, %c0_81, %c0_82] : memref<4x8x8xbf16, #tpu.memory_space<vmem>>, vector<1x8x8xbf16>
      %149 = vector.shape_cast %148 : vector<1x8x8xbf16> to vector<8x8xbf16>
      %150 = vector.shape_cast %147 : vector<8x8xbf16> to vector<1x8x8xbf16>
      tpu.vector_store %arg16[%c1, %c0_81, %c0_82], %150 {strides = array<i32>} : memref<4x8x8xbf16, #tpu.memory_space<vmem>>, vector<1x8x8xbf16>,
      %151 = vector.extract_strided_slice %131 {offsets = [0, 8], sizes = [8, 8], strides = [1, 1]} : vector<8x32xbf16> to vector<8x8xbf16>
      %c1_83 = arith.constant 1 : index
      %c0_84 = arith.constant 0 : index
      %c0_85 = arith.constant 0 : index
      %152 = vector.load %arg17[%c1_83, %c0_84, %c0_85] : memref<4x8x8xbf16, #tpu.memory_space<vmem>>, vector<1x8x8xbf16>
      %153 = vector.shape_cast %152 : vector<1x8x8xbf16> to vector<8x8xbf16>
      %154 = vector.shape_cast %151 : vector<8x8xbf16> to vector<1x8x8xbf16>
      tpu.vector_store %arg17[%c1_83, %c0_84, %c0_85], %154 {strides = array<i32>} : memref<4x8x8xbf16, #tpu.memory_space<vmem>>, vector<1x8x8xbf16>,
      %155 = vector.extract_strided_slice %134 {offsets = [0, 8], sizes = [8, 8], strides = [1, 1]} : vector<8x32xbf16> to vector<8x8xbf16>
      %c1_86 = arith.constant 1 : index
      %c0_87 = arith.constant 0 : index
      %c0_88 = arith.constant 0 : index
      %156 = vector.load %arg18[%c1_86, %c0_87, %c0_88] : memref<4x8x8xbf16, #tpu.memory_space<vmem>>, vector<1x8x8xbf16>
      %157 = vector.shape_cast %156 : vector<1x8x8xbf16> to vector<8x8xbf16>
      %158 = vector.shape_cast %155 : vector<8x8xbf16> to vector<1x8x8xbf16>
      tpu.vector_store %arg18[%c1_86, %c0_87, %c0_88], %158 {strides = array<i32>} : memref<4x8x8xbf16, #tpu.memory_space<vmem>>, vector<1x8x8xbf16>,
      %159 = vector.extract_strided_slice %128 {offsets = [0, 16], sizes = [8, 8], strides = [1, 1]} : vector<8x32xbf16> to vector<8x8xbf16>
      %c2 = arith.constant 2 : index
      %c0_89 = arith.constant 0 : index
      %c0_90 = arith.constant 0 : index
      %160 = vector.load %arg16[%c2, %c0_89, %c0_90] : memref<4x8x8xbf16, #tpu.memory_space<vmem>>, vector<1x8x8xbf16>
      %161 = vector.shape_cast %160 : vector<1x8x8xbf16> to vector<8x8xbf16>
      %162 = vector.shape_cast %159 : vector<8x8xbf16> to vector<1x8x8xbf16>
      tpu.vector_store %arg16[%c2, %c0_89, %c0_90], %162 {strides = array<i32>} : memref<4x8x8xbf16, #tpu.memory_space<vmem>>, vector<1x8x8xbf16>,
      %163 = vector.extract_strided_slice %131 {offsets = [0, 16], sizes = [8, 8], strides = [1, 1]} : vector<8x32xbf16> to vector<8x8xbf16>
      %c2_91 = arith.constant 2 : index
      %c0_92 = arith.constant 0 : index
      %c0_93 = arith.constant 0 : index
      %164 = vector.load %arg17[%c2_91, %c0_92, %c0_93] : memref<4x8x8xbf16, #tpu.memory_space<vmem>>, vector<1x8x8xbf16>
      %165 = vector.shape_cast %164 : vector<1x8x8xbf16> to vector<8x8xbf16>
      %166 = vector.shape_cast %163 : vector<8x8xbf16> to vector<1x8x8xbf16>
      tpu.vector_store %arg17[%c2_91, %c0_92, %c0_93], %166 {strides = array<i32>} : memref<4x8x8xbf16, #tpu.memory_space<vmem>>, vector<1x8x8xbf16>,
      %167 = vector.extract_strided_slice %134 {offsets = [0, 16], sizes = [8, 8], strides = [1, 1]} : vector<8x32xbf16> to vector<8x8xbf16>
      %c2_94 = arith.constant 2 : index
      %c0_95 = arith.constant 0 : index
      %c0_96 = arith.constant 0 : index
      %168 = vector.load %arg18[%c2_94, %c0_95, %c0_96] : memref<4x8x8xbf16, #tpu.memory_space<vmem>>, vector<1x8x8xbf16>
      %169 = vector.shape_cast %168 : vector<1x8x8xbf16> to vector<8x8xbf16>
      %170 = vector.shape_cast %167 : vector<8x8xbf16> to vector<1x8x8xbf16>
      tpu.vector_store %arg18[%c2_94, %c0_95, %c0_96], %170 {strides = array<i32>} : memref<4x8x8xbf16, #tpu.memory_space<vmem>>, vector<1x8x8xbf16>,
      %171 = vector.extract_strided_slice %128 {offsets = [0, 24], sizes = [8, 8], strides = [1, 1]} : vector<8x32xbf16> to vector<8x8xbf16>
      %c3 = arith.constant 3 : index
      %c0_97 = arith.constant 0 : index
      %c0_98 = arith.constant 0 : index
      %172 = vector.load %arg16[%c3, %c0_97, %c0_98] : memref<4x8x8xbf16, #tpu.memory_space<vmem>>, vector<1x8x8xbf16>
      %173 = vector.shape_cast %172 : vector<1x8x8xbf16> to vector<8x8xbf16>
      %174 = vector.shape_cast %171 : vector<8x8xbf16> to vector<1x8x8xbf16>
      tpu.vector_store %arg16[%c3, %c0_97, %c0_98], %174 {strides = array<i32>} : memref<4x8x8xbf16, #tpu.memory_space<vmem>>, vector<1x8x8xbf16>,
      %175 = vector.extract_strided_slice %131 {offsets = [0, 24], sizes = [8, 8], strides = [1, 1]} : vector<8x32xbf16> to vector<8x8xbf16>
      %c3_99 = arith.constant 3 : index
      %c0_100 = arith.constant 0 : index
      %c0_101 = arith.constant 0 : index
      %176 = vector.load %arg17[%c3_99, %c0_100, %c0_101] : memref<4x8x8xbf16, #tpu.memory_space<vmem>>, vector<1x8x8xbf16>
      %177 = vector.shape_cast %176 : vector<1x8x8xbf16> to vector<8x8xbf16>
      %178 = vector.shape_cast %175 : vector<8x8xbf16> to vector<1x8x8xbf16>
      tpu.vector_store %arg17[%c3_99, %c0_100, %c0_101], %178 {strides = array<i32>} : memref<4x8x8xbf16, #tpu.memory_space<vmem>>, vector<1x8x8xbf16>,
      %179 = vector.extract_strided_slice %134 {offsets = [0, 24], sizes = [8, 8], strides = [1, 1]} : vector<8x32xbf16> to vector<8x8xbf16>
      %c3_102 = arith.constant 3 : index
      %c0_103 = arith.constant 0 : index
      %c0_104 = arith.constant 0 : index
      %180 = vector.load %arg18[%c3_102, %c0_103, %c0_104] : memref<4x8x8xbf16, #tpu.memory_space<vmem>>, vector<1x8x8xbf16>
      %181 = vector.shape_cast %180 : vector<1x8x8xbf16> to vector<8x8xbf16>
      %182 = vector.shape_cast %179 : vector<8x8xbf16> to vector<1x8x8xbf16>
      tpu.vector_store %arg18[%c3_102, %c0_103, %c0_104], %182 {strides = array<i32>} : memref<4x8x8xbf16, #tpu.memory_space<vmem>>, vector<1x8x8xbf16>,
    } else {
    }
    %c0 = arith.constant 0 : index
    %c0_1 = arith.constant 0 : index
    %c0_2 = arith.constant 0 : index
    %3 = vector.load %arg2[%c0, %c0_1, %c0_2] : memref<1x8x32xbf16, #tpu.memory_space<vmem>>, vector<1x8x32xbf16>
    %4 = vector.shape_cast %3 : vector<1x8x32xbf16> to vector<8x32xbf16>
    %5 = arith.extf %4 : vector<8x32xbf16> to vector<8x32xf32>
    %c0_3 = arith.constant 0 : index
    %c0_4 = arith.constant 0 : index
    %c0_5 = arith.constant 0 : index
    %6 = vector.load %arg4[%c0_3, %c0_4, %c0_5] : memref<1x1x8xf32, #tpu.memory_space<vmem>>, vector<1x1x8xf32>
    %7 = vector.shape_cast %6 : vector<1x1x8xf32> to vector<1x8xf32>
    %cst_6 = arith.constant 0.000000e+00 : f32
    %8 = vector.broadcast %cst_6 : f32 to vector<1x8xf32>
    %9 = arith.cmpf ogt, %7, %8 : vector<1x8xf32>
    %cst_7 = arith.constant 0.000000e+00 : f32
    %cst_8 = arith.constant -1.000000e+09 : f32
    %10 = vector.broadcast %cst_7 : f32 to vector<1x8xf32>
    %11 = vector.broadcast %cst_8 : f32 to vector<1x8xf32>
    %12 = arith.select %9, %10, %11 : vector<1x8xi1>, vector<1x8xf32>
    %c8_i32 = arith.constant 8 : i32
    %13 = arith.muli %arg1, %c8_i32 : i32
    %14 = tpu.assume_multiple %13, 8 : i32
    %c0_9 = arith.constant 0 : index
    %15 = arith.index_cast %14 : i32 to index
    %c0_10 = arith.constant 0 : index
    %16 = vector.load %arg16[%c0_9, %15, %c0_10] : memref<4x8x8xbf16, #tpu.memory_space<vmem>>, vector<4x8x8xbf16>
    %c0_11 = arith.constant 0 : index
    %c0_12 = arith.constant 0 : index
    %c0_13 = arith.constant 0 : index
    %17 = vector.load %arg17[%c0_11, %c0_12, %c0_13] : memref<4x8x8xbf16, #tpu.memory_space<vmem>>, vector<4x8x8xbf16>
    %c0_14 = arith.constant 0 : index
    %c0_15 = arith.constant 0 : index
    %c0_16 = arith.constant 0 : index
    %18 = vector.load %arg18[%c0_14, %c0_15, %c0_16] : memref<4x8x8xbf16, #tpu.memory_space<vmem>>, vector<4x8x8xbf16>
    "tpu.trace_start"() <{level = 10 : i32, message = "hqd,hkd->hqk"}> : () -> ()
    %cst_17 = arith.constant dense<0.000000e+00> : vector<4x8x8xf32>
    %19 = tpu.matmul %16, %17, %cst_17 {dimension_numbers = #tpu.dot_dimension_numbers<[2], [2], [1], [1], [0, 0, 0, 1, 1, 1], [0], [0]>} : vector<4x8x8xbf16>, vector<4x8x8xbf16>, vector<4x8x8xf32> -> vector<4x8x8xf32>
    "tpu.trace_stop"() : () -> ()
    %20 = vector.shape_cast %12 : vector<1x8xf32> to vector<1x1x8xf32>
    %21 = vector.broadcast %20 : vector<1x1x8xf32> to vector<4x8x8xf32>
    %22 = arith.addf %19, %21 : vector<4x8x8xf32>
    %cst_18 = arith.constant dense<0xFF800000> : vector<4x8xf32>
    %23 = vector.multi_reduction <maximumf>, %22, %cst_18 [2] : vector<4x8x8xf32> to vector<4x8xf32>
    %24 = vector.shape_cast %23 : vector<4x8xf32> to vector<4x8x1xf32>
    %25 = vector.broadcast %24 : vector<4x8x1xf32> to vector<4x8x8xf32>
    %26 = arith.subf %22, %25 : vector<4x8x8xf32>
    %27 = math.exp %26 : vector<4x8x8xf32>
    %cst_19 = arith.constant dense<0.000000e+00> : vector<4x8xf32>
    %28 = vector.multi_reduction <add>, %27, %cst_19 [2] : vector<4x8x8xf32> to vector<4x8xf32>
    %29 = vector.shape_cast %28 : vector<4x8xf32> to vector<4x8x1xf32>
    %30 = tpu.reciprocal %29 {approx = true} : vector<4x8x1xf32> -> vector<4x8x1xf32>
    %31 = arith.truncf %27 : vector<4x8x8xf32> to vector<4x8x8xbf16>
    "tpu.trace_start"() <{level = 10 : i32, message = "hqk,hkd->hqd"}> : () -> ()
    %cst_20 = arith.constant dense<0.000000e+00> : vector<4x8x8xf32>
    %32 = tpu.matmul %31, %18, %cst_20 {dimension_numbers = #tpu.dot_dimension_numbers<[2], [1], [1], [2], [0, 0, 0, 1, 1, 2], [0], [0]>} : vector<4x8x8xbf16>, vector<4x8x8xbf16>, vector<4x8x8xf32> -> vector<4x8x8xf32>
    "tpu.trace_stop"() : () -> ()
    %33 = vector.broadcast %30 : vector<4x8x1xf32> to vector<4x8x8xf32>
    %34 = arith.mulf %32, %33 : vector<4x8x8xf32>
    %35 = arith.truncf %34 : vector<4x8x8xf32> to vector<4x8x8xbf16>
    %c0_21 = arith.constant 0 : index
    %c0_22 = arith.constant 0 : index
    %c0_23 = arith.constant 0 : index
    %36 = vector.load %arg8[%c0_21, %c0_22, %c0_23] : memref<4x8x32xbf16, #tpu.memory_space<vmem>>, vector<4x8x32xbf16>
    "tpu.trace_start"() <{level = 10 : i32, message = "hqd,hde->hqe"}> : () -> ()
    %cst_24 = arith.constant dense<0.000000e+00> : vector<4x8x32xf32>
    %37 = tpu.matmul %35, %36, %cst_24 {dimension_numbers = #tpu.dot_dimension_numbers<[2], [1], [1], [2], [0, 0, 0, 1, 1, 2], [0], [0]>} : vector<4x8x8xbf16>, vector<4x8x32xbf16>, vector<4x8x32xf32> -> vector<4x8x32xf32>
    "tpu.trace_stop"() : () -> ()
    %cst_25 = arith.constant dense<0.000000e+00> : vector<8x32xf32>
    %38 = vector.multi_reduction <add>, %37, %cst_25 [0] : vector<4x8x32xf32> to vector<8x32xf32>
    %39 = arith.addf %5, %38 : vector<8x32xf32>
    %c0_26 = arith.constant 0 : index
    %c0_27 = arith.constant 0 : index
    %40 = vector.load %arg9[%c0_26, %c0_27] : memref<1x32xf32, #tpu.memory_space<vmem>>, vector<1x32xf32>
    %c0_28 = arith.constant 0 : index
    %c0_29 = arith.constant 0 : index
    %41 = vector.load %arg10[%c0_28, %c0_29] : memref<1x32xf32, #tpu.memory_space<vmem>>, vector<1x32xf32>
    %cst_30 = arith.constant dense<0.000000e+00> : vector<8xf32>
    %42 = vector.multi_reduction <add>, %39, %cst_30 [1] : vector<8x32xf32> to vector<8xf32>
    %43 = vector.shape_cast %42 : vector<8xf32> to vector<8x1xf32>
    %cst_31 = arith.constant 3.200000e+01 : f32
    %44 = vector.broadcast %cst_31 : f32 to vector<8x1xf32>
    %45 = arith.divf %43, %44 : vector<8x1xf32>
    %46 = vector.broadcast %45 : vector<8x1xf32> to vector<8x32xf32>
    %47 = arith.subf %39, %46 : vector<8x32xf32>
    %48 = arith.mulf %47, %47 : vector<8x32xf32>
    %cst_32 = arith.constant dense<0.000000e+00> : vector<8xf32>
    %49 = vector.multi_reduction <add>, %48, %cst_32 [1] : vector<8x32xf32> to vector<8xf32>
    %50 = vector.shape_cast %49 : vector<8xf32> to vector<8x1xf32>
    %cst_33 = arith.constant 3.200000e+01 : f32
    %51 = vector.broadcast %cst_33 : f32 to vector<8x1xf32>
    %52 = arith.divf %50, %51 : vector<8x1xf32>
    %53 = vector.broadcast %45 : vector<8x1xf32> to vector<8x32xf32>
    %54 = arith.subf %39, %53 : vector<8x32xf32>
    %cst_34 = arith.constant 9.99999974E-6 : f32
    %55 = vector.broadcast %cst_34 : f32 to vector<8x1xf32>
    %56 = arith.addf %52, %55 : vector<8x1xf32>
    %57 = math.rsqrt %56 : vector<8x1xf32>
    %58 = vector.broadcast %57 : vector<8x1xf32> to vector<8x32xf32>
    %59 = arith.mulf %54, %58 : vector<8x32xf32>
    %60 = vector.broadcast %40 : vector<1x32xf32> to vector<8x32xf32>
    %61 = arith.mulf %59, %60 : vector<8x32xf32>
    %62 = vector.broadcast %41 : vector<1x32xf32> to vector<8x32xf32>
    %63 = arith.addf %61, %62 : vector<8x32xf32>
    %64 = arith.truncf %63 : vector<8x32xf32> to vector<8x32xbf16>
    %cst_35 = arith.constant 0.000000e+00 : f32
    %65 = vector.broadcast %cst_35 : f32 to vector<8x32xf32>
    %c0_36 = arith.constant 0 : index
    %c0_37 = arith.constant 0 : index
    %66 = vector.load %arg11[%c0_36, %c0_37] : memref<32x128xbf16, #tpu.memory_space<vmem>>, vector<32x128xbf16>
    %cst_38 = arith.constant dense<0.000000e+00> : vector<8x128xf32>
    %67 = tpu.matmul %64, %66, %cst_38 {dimension_numbers = #tpu.dot_dimension_numbers<[1], [0], [0], [1], [0, 0, 1, 1], [], []>} : vector<8x32xbf16>, vector<32x128xbf16>, vector<8x128xf32> -> vector<8x128xf32>
    %c0_39 = arith.constant 0 : index
    %c0_40 = arith.constant 0 : index
    %68 = vector.load %arg12[%c0_39, %c0_40] : memref<1x128xf32, #tpu.memory_space<vmem>>, vector<1x128xf32>
    %69 = vector.broadcast %68 : vector<1x128xf32> to vector<8x128xf32>
    %70 = arith.addf %67, %69 : vector<8x128xf32>
    %cst_41 = arith.constant 5.000000e-01 : f32
    %71 = vector.broadcast %cst_41 : f32 to vector<8x128xf32>
    %72 = arith.mulf %71, %70 : vector<8x128xf32>
    %cst_42 = arith.constant 4.471500e-02 : f32
    %73 = vector.broadcast %cst_42 : f32 to vector<8x128xf32>
    %74 = arith.mulf %73, %70 : vector<8x128xf32>
    %75 = arith.mulf %74, %70 : vector<8x128xf32>
    %76 = arith.mulf %75, %70 : vector<8x128xf32>
    %77 = arith.addf %70, %76 : vector<8x128xf32>
    %cst_43 = arith.constant 0.797884583 : f32
    %78 = vector.broadcast %cst_43 : f32 to vector<8x128xf32>
    %79 = arith.mulf %78, %77 : vector<8x128xf32>
    %80 = math.tanh %79 : vector<8x128xf32>
    %cst_44 = arith.constant 1.000000e+00 : f32
    %81 = vector.broadcast %cst_44 : f32 to vector<8x128xf32>
    %82 = arith.addf %81, %80 : vector<8x128xf32>
    %83 = arith.mulf %72, %82 : vector<8x128xf32>
    %84 = arith.truncf %83 : vector<8x128xf32> to vector<8x128xbf16>
    %c0_45 = arith.constant 0 : index
    %c0_46 = arith.constant 0 : index
    %85 = vector.load %arg13[%c0_45, %c0_46] : memref<128x32xbf16, #tpu.memory_space<vmem>>, vector<128x32xbf16>
    %cst_47 = arith.constant dense<0.000000e+00> : vector<8x32xf32>
    %86 = tpu.matmul %84, %85, %cst_47 {dimension_numbers = #tpu.dot_dimension_numbers<[1], [0], [0], [1], [0, 0, 1, 1], [], []>} : vector<8x128xbf16>, vector<128x32xbf16>, vector<8x32xf32> -> vector<8x32xf32>
    %87 = arith.addf %65, %86 : vector<8x32xf32>
    %c0_48 = arith.constant 0 : index
    %c0_49 = arith.constant 0 : index
    %88 = vector.load %arg14[%c0_48, %c0_49] : memref<1x32xf32, #tpu.memory_space<vmem>>, vector<1x32xf32>
    %89 = vector.broadcast %88 : vector<1x32xf32> to vector<8x32xf32>
    %90 = arith.addf %87, %89 : vector<8x32xf32>
    %91 = arith.addf %39, %90 : vector<8x32xf32>
    %92 = arith.truncf %91 : vector<8x32xf32> to vector<8x32xbf16>
    %c0_50 = arith.constant 0 : index
    %c0_51 = arith.constant 0 : index
    %c0_52 = arith.constant 0 : index
    %93 = vector.load %arg15[%c0_50, %c0_51, %c0_52] : memref<1x8x32xbf16, #tpu.memory_space<vmem>>, vector<1x8x32xbf16>
    %94 = vector.shape_cast %93 : vector<1x8x32xbf16> to vector<8x32xbf16>
    %95 = vector.shape_cast %92 : vector<8x32xbf16> to vector<1x8x32xbf16>
    tpu.vector_store %arg15[%c0_50, %c0_51, %c0_52], %95 {strides = array<i32>} : memref<1x8x32xbf16, #tpu.memory_space<vmem>>, vector<1x8x32xbf16>,
    return
  }
  func.func @transform_0(%arg0: i32, %arg1: i32) -> (i32, i32, i32) {
    %c0_i32 = arith.constant 0 : i32
    %c0_i32_0 = arith.constant 0 : i32
    return %arg0, %arg1, %c0_i32 : i32, i32, i32
  }
  func.func @transform_1(%arg0: i32, %arg1: i32) -> (i32, i32, i32) {
    %c0_i32 = arith.constant 0 : i32
    %c0_i32_0 = arith.constant 0 : i32
    %c0_i32_1 = arith.constant 0 : i32
    return %arg0, %c0_i32, %c0_i32_0 : i32, i32, i32
  }
  func.func @transform_2(%arg0: i32, %arg1: i32) -> (i32, i32, i32) {
    %c0_i32 = arith.constant 0 : i32
    %c0_i32_0 = arith.constant 0 : i32
    %c0_i32_1 = arith.constant 0 : i32
    return %arg0, %c0_i32, %c0_i32_0 : i32, i32, i32
  }
  func.func @transform_3(%arg0: i32, %arg1: i32) -> (i32, i32) {
    %c0_i32 = arith.constant 0 : i32
    %c0_i32_0 = arith.constant 0 : i32
    %c0_i32_1 = arith.constant 0 : i32
    return %c0_i32, %c0_i32_0 : i32, i32
  }
  func.func @transform_4(%arg0: i32, %arg1: i32) -> (i32, i32) {
    %c0_i32 = arith.constant 0 : i32
    %c0_i32_0 = arith.constant 0 : i32
    %c0_i32_1 = arith.constant 0 : i32
    return %c0_i32, %c0_i32_0 : i32, i32
  }
  func.func @transform_5(%arg0: i32, %arg1: i32) -> (i32, i32) {
    %c0_i32 = arith.constant 0 : i32
    %c0_i32_0 = arith.constant 0 : i32
    %c0_i32_1 = arith.constant 0 : i32
    return %c0_i32, %c0_i32_0 : i32, i32
  }
  func.func @transform_6(%arg0: i32, %arg1: i32) -> (i32, i32, i32) {
    %c0_i32 = arith.constant 0 : i32
    %c0_i32_0 = arith.constant 0 : i32
    %c0_i32_1 = arith.constant 0 : i32
    %c0_i32_2 = arith.constant 0 : i32
    return %c0_i32, %c0_i32_0, %c0_i32_1 : i32, i32, i32
  }
  func.func @transform_7(%arg0: i32, %arg1: i32) -> (i32, i32) {
    %c0_i32 = arith.constant 0 : i32
    %c0_i32_0 = arith.constant 0 : i32
    %c0_i32_1 = arith.constant 0 : i32
    return %c0_i32, %c0_i32_0 : i32, i32
  }
  func.func @transform_8(%arg0: i32, %arg1: i32) -> (i32, i32) {
    %c0_i32 = arith.constant 0 : i32
    %c0_i32_0 = arith.constant 0 : i32
    %c0_i32_1 = arith.constant 0 : i32
    return %c0_i32, %c0_i32_0 : i32, i32
  }
  func.func @transform_9(%arg0: i32, %arg1: i32) -> (i32, i32) {
    %c0_i32 = arith.constant 0 : i32
    %c0_i32_0 = arith.constant 0 : i32
    %c0_i32_1 = arith.constant 0 : i32
    return %c0_i32, %c0_i32_0 : i32, i32
  }
  func.func @transform_10(%arg0: i32, %arg1: i32) -> (i32, i32) {
    %c0_i32 = arith.constant 0 : i32
    %c0_i32_0 = arith.constant 0 : i32
    %c0_i32_1 = arith.constant 0 : i32
    return %c0_i32, %c0_i32_0 : i32, i32
  }
  func.func @transform_11(%arg0: i32, %arg1: i32) -> (i32, i32) {
    %c0_i32 = arith.constant 0 : i32
    %c0_i32_0 = arith.constant 0 : i32
    %c0_i32_1 = arith.constant 0 : i32
    return %c0_i32, %c0_i32_0 : i32, i32
  }
  func.func @transform_12(%arg0: i32, %arg1: i32) -> (i32, i32) {
    %c0_i32 = arith.constant 0 : i32
    %c0_i32_0 = arith.constant 0 : i32
    %c0_i32_1 = arith.constant 0 : i32
    return %c0_i32, %c0_i32_0 : i32, i32
  }
  func.func @transform_13(%arg0: i32, %arg1: i32) -> (i32, i32, i32) {
    %c0_i32 = arith.constant 0 : i32
    %c0_i32_0 = arith.constant 0 : i32
    return %arg0, %arg1, %c0_i32 : i32, i32, i32
  }
}

module attributes {stable_mosaic.version = 11 : i64} {
  func.func @encoder_block_kernel(%arg0: i32, %arg1: i32, %arg2: memref<1x8x32xbf16, #tpu.memory_space<vmem>>, %arg3: memref<1x8x32xbf16, #tpu.memory_space<vmem>>, %arg4: memref<1x1x8xf32, #tpu.memory_space<vmem>>, %arg5: memref<1x32xf32, #tpu.memory_space<vmem>>, %arg6: memref<1x32xf32, #tpu.memory_space<vmem>>, %arg7: memref<32x96xbf16, #tpu.memory_space<vmem>>, %arg8: memref<4x8x32xbf16, #tpu.memory_space<vmem>>, %arg9: memref<1x32xf32, #tpu.memory_space<vmem>>, %arg10: memref<1x32xf32, #tpu.memory_space<vmem>>, %arg11: memref<32x128xbf16, #tpu.memory_space<vmem>>, %arg12: memref<1x128xf32, #tpu.memory_space<vmem>>, %arg13: memref<128x32xbf16, #tpu.memory_space<vmem>>, %arg14: memref<1x32xf32, #tpu.memory_space<vmem>>, %arg15: memref<1x8x32xbf16, #tpu.memory_space<vmem>>, %arg16: memref<4x8x8xbf16, #tpu.memory_space<vmem>>, %arg17: memref<4x8x8xbf16, #tpu.memory_space<vmem>>, %arg18: memref<4x8x8xbf16, #tpu.memory_space<vmem>>) attributes {dimension_semantics = [#tpu.dimension_semantics<parallel>, #tpu.dimension_semantics<arbitrary>], iteration_bounds = array<i64: 2, 1>, scalar_prefetch = 0 : i64, scratch_operands = 3 : i64, tpu.core_type = #tpu.core_type<tc>, window_params = [{transform_indices = @transform_0, window_bounds = array<i64: 1, 8, 32>}, {transform_indices = @transform_1, window_bounds = array<i64: 1, 8, 32>}, {transform_indices = @transform_2, window_bounds = array<i64: 1, 1, 8>}, {pipeline_mode = #tpu.pipeline_mode<synchronous>, transform_indices = @transform_3, window_bounds = array<i64: 1, 32>}, {pipeline_mode = #tpu.pipeline_mode<synchronous>, transform_indices = @transform_4, window_bounds = array<i64: 1, 32>}, {pipeline_mode = #tpu.pipeline_mode<synchronous>, transform_indices = @transform_5, window_bounds = array<i64: 32, 96>}, {pipeline_mode = #tpu.pipeline_mode<synchronous>, transform_indices = @transform_6, window_bounds = array<i64: 4, 8, 32>}, {pipeline_mode = #tpu.pipeline_mode<synchronous>, transform_indices = @transform_7, window_bounds = array<i64: 1, 32>}, {pipeline_mode = #tpu.pipeline_mode<synchronous>, transform_indices = @transform_8, window_bounds = array<i64: 1, 32>}, {pipeline_mode = #tpu.pipeline_mode<synchronous>, transform_indices = @transform_9, window_bounds = array<i64: 32, 128>}, {pipeline_mode = #tpu.pipeline_mode<synchronous>, transform_indices = @transform_10, window_bounds = array<i64: 1, 128>}, {pipeline_mode = #tpu.pipeline_mode<synchronous>, transform_indices = @transform_11, window_bounds = array<i64: 128, 32>}, {pipeline_mode = #tpu.pipeline_mode<synchronous>, transform_indices = @transform_12, window_bounds = array<i64: 1, 32>}, {transform_indices = @transform_13, window_bounds = array<i64: 1, 8, 32>}]} {
    %c0_i32 = arith.constant 0 : i32
    %0 = arith.cmpi eq, %arg1, %c0_i32 : i32
    %1 = arith.extui %0 : i1 to i32
    %cst = arith.constant 0.353553385 : f32
    %c0_i32_0 = arith.constant 0 : i32
    %2 = arith.cmpi ne, %1, %c0_i32_0 : i32
    scf.if %2 {
      %c0_53 = arith.constant 0 : index
      %c0_54 = arith.constant 0 : index
      %c0_55 = arith.constant 0 : index
      %96 = vector.load %arg3[%c0_53, %c0_54, %c0_55] : memref<1x8x32xbf16, #tpu.memory_space<vmem>>, vector<1x8x32xbf16>
      %97 = vector.shape_cast %96 : vector<1x8x32xbf16> to vector<8x32xbf16>
      %98 = arith.extf %97 : vector<8x32xbf16> to vector<8x32xf32>
      %c0_56 = arith.constant 0 : index
      %c0_57 = arith.constant 0 : index
      %99 = vector.load %arg5[%c0_56, %c0_57] : memref<1x32xf32, #tpu.memory_space<vmem>>, vector<1x32xf32>
      %c0_58 = arith.constant 0 : index
      %c0_59 = arith.constant 0 : index
      %100 = vector.load %arg6[%c0_58, %c0_59] : memref<1x32xf32, #tpu.memory_space<vmem>>, vector<1x32xf32>
      %cst_60 = arith.constant dense<0.000000e+00> : vector<8xf32>
      %101 = vector.multi_reduction <add>, %98, %cst_60 [1] : vector<8x32xf32> to vector<8xf32>
      %102 = vector.shape_cast %101 : vector<8xf32> to vector<8x1xf32>
      %cst_61 = arith.constant 3.200000e+01 : f32
      %103 = vector.broadcast %cst_61 : f32 to vector<8x1xf32>
      %104 = arith.divf %102, %103 : vector<8x1xf32>
      %105 = vector.broadcast %104 : vector<8x1xf32> to vector<8x32xf32>
      %106 = arith.subf %98, %105 : vector<8x32xf32>
      %107 = arith.mulf %106, %106 : vector<8x32xf32>
      %cst_62 = arith.constant dense<0.000000e+00> : vector<8xf32>
      %108 = vector.multi_reduction <add>, %107, %cst_62 [1] : vector<8x32xf32> to vector<8xf32>
      %109 = vector.shape_cast %108 : vector<8xf32> to vector<8x1xf32>
      %cst_63 = arith.constant 3.200000e+01 : f32
      %110 = vector.broadcast %cst_63 : f32 to vector<8x1xf32>
      %111 = arith.divf %109, %110 : vector<8x1xf32>
      %112 = vector.broadcast %104 : vector<8x1xf32> to vector<8x32xf32>
      %113 = arith.subf %98, %112 : vector<8x32xf32>
      %cst_64 = arith.constant 9.99999974E-6 : f32
      %114 = vector.broadcast %cst_64 : f32 to vector<8x1xf32>
      %115 = arith.addf %111, %114 : vector<8x1xf32>
      %116 = math.rsqrt %115 : vector<8x1xf32>
      %117 = vector.broadcast %116 : vector<8x1xf32> to vector<8x32xf32>
      %118 = arith.mulf %113, %117 : vector<8x32xf32>
      %119 = vector.broadcast %99 : vector<1x32xf32> to vector<8x32xf32>
      %120 = arith.mulf %118, %119 : vector<8x32xf32>
      %121 = vector.broadcast %100 : vector<1x32xf32> to vector<8x32xf32>
      %122 = arith.addf %120, %121 : vector<8x32xf32>
      %123 = arith.truncf %122 : vector<8x32xf32> to vector<8x32xbf16>
      %c0_65 = arith.constant 0 : index
      %c0_66 = arith.constant 0 : index
      %124 = vector.load %arg7[%c0_65, %c0_66] : memref<32x96xbf16, #tpu.memory_space<vmem>>, vector<32x32xbf16>
      %cst_67 = arith.constant dense<0.000000e+00> : vector<8x32xf32>
      %125 = tpu.matmul %123, %124, %cst_67 {dimension_numbers = #tpu.dot_dimension_numbers<[1], [0], [0], [1], [0, 0, 1, 1], [], []>} : vector<8x32xbf16>, vector<32x32xbf16>, vector<8x32xf32> -> vector<8x32xf32>
      %126 = vector.broadcast %cst : f32 to vector<8x32xf32>
      %127 = arith.mulf %125, %126 : vector<8x32xf32>
      %128 = arith.truncf %127 : vector<8x32xf32> to vector<8x32xbf16>
      %c0_68 = arith.constant 0 : index
      %c32 = arith.constant 32 : index
      %129 = vector.load %arg7[%c0_68, %c32] : memref<32x96xbf16, #tpu.memory_space<vmem>>, vector<32x32xbf16>
      %cst_69 = arith.constant dense<0.000000e+00> : vector<8x32xf32>
      %130 = tpu.matmul %123, %129, %cst_69 {dimension_numbers = #tpu.dot_dimension_numbers<[1], [0], [0], [1], [0, 0, 1, 1], [], []>} : vector<8x32xbf16>, vector<32x32xbf16>, vector<8x32xf32> -> vector<8x32xf32>
      %131 = arith.truncf %130 : vector<8x32xf32> to vector<8x32xbf16>
      %c0_70 = arith.constant 0 : index
      %c64 = arith.constant 64 : index
      %132 = vector.load %arg7[%c0_70, %c64] : memref<32x96xbf16, #tpu.memory_space<vmem>>, vector<32x32xbf16>
      %cst_71 = arith.constant dense<0.000000e+00> : vector<8x32xf32>
      %133 = tpu.matmul %123, %132, %cst_71 {dimension_numbers = #tpu.dot_dimension_numbers<[1], [0], [0], [1], [0, 0, 1, 1], [], []>} : vector<8x32xbf16>, vector<32x32xbf16>, vector<8x32xf32> -> vector<8x32xf32>
      %134 = arith.truncf %133 : vector<8x32xf32> to vector<8x32xbf16>
      %135 = vector.extract_strided_slice %128 {offsets = [0, 0], sizes = [8, 8], strides = [1, 1]} : vector<8x32xbf16> to vector<8x8xbf16>
      %c0_72 = arith.constant 0 : index
      %c0_73 = arith.constant 0 : index
      %c0_74 = arith.constant 0 : index
      %136 = vector.load %arg16[%c0_72, %c0_73, %c0_74] : memref<4x8x8xbf16, #tpu.memory_space<vmem>>, vector<1x8x8xbf16>
      %137 = vector.shape_cast %136 : vector<1x8x8xbf16> to vector<8x8xbf16>
      %138 = vector.shape_cast %135 : vector<8x8xbf16> to vector<1x8x8xbf16>
      tpu.vector_store %arg16[%c0_72, %c0_73, %c0_74], %138 {strides = array<i32>} : memref<4x8x8xbf16, #tpu.memory_space<vmem>>, vector<1x8x8xbf16>,
      %139 = vector.extract_strided_slice %131 {offsets = [0, 0], sizes = [8, 8], strides = [1, 1]} : vector<8x32xbf16> to vector<8x8xbf16>
      %c0_75 = arith.constant 0 : index
      %c0_76 = arith.constant 0 : index
      %c0_77 = arith.constant 0 : index
      %140 = vector.load %arg17[%c0_75, %c0_76, %c0_77] : memref<4x8x8xbf16, #tpu.memory_space<vmem>>, vector<1x8x8xbf16>
      %141 = vector.shape_cast %140 : vector<1x8x8xbf16> to vector<8x8xbf16>
      %142 = vector.shape_cast %139 : vector<8x8xbf16> to vector<1x8x8xbf16>
      tpu.vector_store %arg17[%c0_75, %c0_76, %c0_77], %142 {strides = array<i32>} : memref<4x8x8xbf16, #tpu.memory_space<vmem>>, vector<1x8x8xbf16>,
      %143 = vector.extract_strided_slice %134 {offsets = [0, 0], sizes = [8, 8], strides = [1, 1]} : vector<8x32xbf16> to vector<8x8xbf16>
      %c0_78 = arith.constant 0 : index
      %c0_79 = arith.constant 0 : index
      %c0_80 = arith.constant 0 : index
      %144 = vector.load %arg18[%c0_78, %c0_79, %c0_80] : memref<4x8x8xbf16, #tpu.memory_space<vmem>>, vector<1x8x8xbf16>
      %145 = vector.shape_cast %144 : vector<1x8x8xbf16> to vector<8x8xbf16>
      %146 = vector.shape_cast %143 : vector<8x8xbf16> to vector<1x8x8xbf16>
      tpu.vector_store %arg18[%c0_78, %c0_79, %c0_80], %146 {strides = array<i32>} : memref<4x8x8xbf16, #tpu.memory_space<vmem>>, vector<1x8x8xbf16>,
      %147 = vector.extract_strided_slice %128 {offsets = [0, 8], sizes = [8, 8], strides = [1, 1]} : vector<8x32xbf16> to vector<8x8xbf16>
      %c1 = arith.constant 1 : index
      %c0_81 = arith.constant 0 : index
      %c0_82 = arith.constant 0 : index
      %148 = vector.load %arg16[%c1, %c0_81, %c0_82] : memref<4x8x8xbf16, #tpu.memory_space<vmem>>, vector<1x8x8xbf16>
      %149 = vector.shape_cast %148 : vector<1x8x8xbf16> to vector<8x8xbf16>
      %150 = vector.shape_cast %147 : vector<8x8xbf16> to vector<1x8x8xbf16>
      tpu.vector_store %arg16[%c1, %c0_81, %c0_82], %150 {strides = array<i32>} : memref<4x8x8xbf16, #tpu.memory_space<vmem>>, vector<1x8x8xbf16>,
      %151 = vector.extract_strided_slice %131 {offsets = [0, 8], sizes = [8, 8], strides = [1, 1]} : vector<8x32xbf16> to vector<8x8xbf16>
      %c1_83 = arith.constant 1 : index
      %c0_84 = arith.constant 0 : index
      %c0_85 = arith.constant 0 : index
      %152 = vector.load %arg17[%c1_83, %c0_84, %c0_85] : memref<4x8x8xbf16, #tpu.memory_space<vmem>>, vector<1x8x8xbf16>
      %153 = vector.shape_cast %152 : vector<1x8x8xbf16> to vector<8x8xbf16>
      %154 = vector.shape_cast %151 : vector<8x8xbf16> to vector<1x8x8xbf16>
      tpu.vector_store %arg17[%c1_83, %c0_84, %c0_85], %154 {strides = array<i32>} : memref<4x8x8xbf16, #tpu.memory_space<vmem>>, vector<1x8x8xbf16>,
      %155 = vector.extract_strided_slice %134 {offsets = [0, 8], sizes = [8, 8], strides = [1, 1]} : vector<8x32xbf16> to vector<8x8xbf16>
      %c1_86 = arith.constant 1 : index
      %c0_87 = arith.constant 0 : index
      %c0_88 = arith.constant 0 : index
      %156 = vector.load %arg18[%c1_86, %c0_87, %c0_88] : memref<4x8x8xbf16, #tpu.memory_space<vmem>>, vector<1x8x8xbf16>
      %157 = vector.shape_cast %156 : vector<1x8x8xbf16> to vector<8x8xbf16>
      %158 = vector.shape_cast %155 : vector<8x8xbf16> to vector<1x8x8xbf16>
      tpu.vector_store %arg18[%c1_86, %c0_87, %c0_88], %158 {strides = array<i32>} : memref<4x8x8xbf16, #tpu.memory_space<vmem>>, vector<1x8x8xbf16>,
      %159 = vector.extract_strided_slice %128 {offsets = [0, 16], sizes = [8, 8], strides = [1, 1]} : vector<8x32xbf16> to vector<8x8xbf16>
      %c2 = arith.constant 2 : index
      %c0_89 = arith.constant 0 : index
      %c0_90 = arith.constant 0 : index
      %160 = vector.load %arg16[%c2, %c0_89, %c0_90] : memref<4x8x8xbf16, #tpu.memory_space<vmem>>, vector<1x8x8xbf16>
      %161 = vector.shape_cast %160 : vector<1x8x8xbf16> to vector<8x8xbf16>
      %162 = vector.shape_cast %159 : vector<8x8xbf16> to vector<1x8x8xbf16>
      tpu.vector_store %arg16[%c2, %c0_89, %c0_90], %162 {strides = array<i32>} : memref<4x8x8xbf16, #tpu.memory_space<vmem>>, vector<1x8x8xbf16>,
      %163 = vector.extract_strided_slice %131 {offsets = [0, 16], sizes = [8, 8], strides = [1, 1]} : vector<8x32xbf16> to vector<8x8xbf16>
      %c2_91 = arith.constant 2 : index
      %c0_92 = arith.constant 0 : index
      %c0_93 = arith.constant 0 : index
      %164 = vector.load %arg17[%c2_91, %c0_92, %c0_93] : memref<4x8x8xbf16, #tpu.memory_space<vmem>>, vector<1x8x8xbf16>
      %165 = vector.shape_cast %164 : vector<1x8x8xbf16> to vector<8x8xbf16>
      %166 = vector.shape_cast %163 : vector<8x8xbf16> to vector<1x8x8xbf16>
      tpu.vector_store %arg17[%c2_91, %c0_92, %c0_93], %166 {strides = array<i32>} : memref<4x8x8xbf16, #tpu.memory_space<vmem>>, vector<1x8x8xbf16>,
      %167 = vector.extract_strided_slice %134 {offsets = [0, 16], sizes = [8, 8], strides = [1, 1]} : vector<8x32xbf16> to vector<8x8xbf16>
      %c2_94 = arith.constant 2 : index
      %c0_95 = arith.constant 0 : index
      %c0_96 = arith.constant 0 : index
      %168 = vector.load %arg18[%c2_94, %c0_95, %c0_96] : memref<4x8x8xbf16, #tpu.memory_space<vmem>>, vector<1x8x8xbf16>
      %169 = vector.shape_cast %168 : vector<1x8x8xbf16> to vector<8x8xbf16>
      %170 = vector.shape_cast %167 : vector<8x8xbf16> to vector<1x8x8xbf16>
      tpu.vector_store %arg18[%c2_94, %c0_95, %c0_96], %170 {strides = array<i32>} : memref<4x8x8xbf16, #tpu.memory_space<vmem>>, vector<1x8x8xbf16>,
      %171 = vector.extract_strided_slice %128 {offsets = [0, 24], sizes = [8, 8], strides = [1, 1]} : vector<8x32xbf16> to vector<8x8xbf16>
      %c3 = arith.constant 3 : index
      %c0_97 = arith.constant 0 : index
      %c0_98 = arith.constant 0 : index
      %172 = vector.load %arg16[%c3, %c0_97, %c0_98] : memref<4x8x8xbf16, #tpu.memory_space<vmem>>, vector<1x8x8xbf16>
      %173 = vector.shape_cast %172 : vector<1x8x8xbf16> to vector<8x8xbf16>
      %174 = vector.shape_cast %171 : vector<8x8xbf16> to vector<1x8x8xbf16>
      tpu.vector_store %arg16[%c3, %c0_97, %c0_98], %174 {strides = array<i32>} : memref<4x8x8xbf16, #tpu.memory_space<vmem>>, vector<1x8x8xbf16>,
      %175 = vector.extract_strided_slice %131 {offsets = [0, 24], sizes = [8, 8], strides = [1, 1]} : vector<8x32xbf16> to vector<8x8xbf16>
      %c3_99 = arith.constant 3 : index
      %c0_100 = arith.constant 0 : index
      %c0_101 = arith.constant 0 : index
      %176 = vector.load %arg17[%c3_99, %c0_100, %c0_101] : memref<4x8x8xbf16, #tpu.memory_space<vmem>>, vector<1x8x8xbf16>
      %177 = vector.shape_cast %176 : vector<1x8x8xbf16> to vector<8x8xbf16>
      %178 = vector.shape_cast %175 : vector<8x8xbf16> to vector<1x8x8xbf16>
      tpu.vector_store %arg17[%c3_99, %c0_100, %c0_101], %178 {strides = array<i32>} : memref<4x8x8xbf16, #tpu.memory_space<vmem>>, vector<1x8x8xbf16>,
      %179 = vector.extract_strided_slice %134 {offsets = [0, 24], sizes = [8, 8], strides = [1, 1]} : vector<8x32xbf16> to vector<8x8xbf16>
      %c3_102 = arith.constant 3 : index
      %c0_103 = arith.constant 0 : index
      %c0_104 = arith.constant 0 : index
      %180 = vector.load %arg18[%c3_102, %c0_103, %c0_104] : memref<4x8x8xbf16, #tpu.memory_space<vmem>>, vector<1x8x8xbf16>
      %181 = vector.shape_cast %180 : vector<1x8x8xbf16> to vector<8x8xbf16>
      %182 = vector.shape_cast %179 : vector<8x8xbf16> to vector<1x8x8xbf16>
      tpu.vector_store %arg18[%c3_102, %c0_103, %c0_104], %182 {strides = array<i32>} : memref<4x8x8xbf16, #tpu.memory_space<vmem>>, vector<1x8x8xbf16>,
    } else {
    }
    %c0 = arith.constant 0 : index
    %c0_1 = arith.constant 0 : index
    %c0_2 = arith.constant 0 : index
    %3 = vector.load %arg2[%c0, %c0_1, %c0_2] : memref<1x8x32xbf16, #tpu.memory_space<vmem>>, vector<1x8x32xbf16>
    %4 = vector.shape_cast %3 : vector<1x8x32xbf16> to vector<8x32xbf16>
    %5 = arith.extf %4 : vector<8x32xbf16> to vector<8x32xf32>
    %c0_3 = arith.constant 0 : index
    %c0_4 = arith.constant 0 : index
    %c0_5 = arith.constant 0 : index
    %6 = vector.load %arg4[%c0_3, %c0_4, %c0_5] : memref<1x1x8xf32, #tpu.memory_space<vmem>>, vector<1x1x8xf32>
    %7 = vector.shape_cast %6 : vector<1x1x8xf32> to vector<1x8xf32>
    %cst_6 = arith.constant 0.000000e+00 : f32
    %8 = vector.broadcast %cst_6 : f32 to vector<1x8xf32>
    %9 = arith.cmpf ogt, %7, %8 : vector<1x8xf32>
    %cst_7 = arith.constant 0.000000e+00 : f32
    %cst_8 = arith.constant -1.000000e+09 : f32
    %10 = vector.broadcast %cst_7 : f32 to vector<1x8xf32>
    %11 = vector.broadcast %cst_8 : f32 to vector<1x8xf32>
    %12 = arith.select %9, %10, %11 : vector<1x8xi1>, vector<1x8xf32>
    %c8_i32 = arith.constant 8 : i32
    %13 = arith.muli %arg1, %c8_i32 : i32
    %14 = tpu.assume_multiple %13, 8 : i32
    %c0_9 = arith.constant 0 : index
    %15 = arith.index_cast %14 : i32 to index
    %c0_10 = arith.constant 0 : index
    %16 = vector.load %arg16[%c0_9, %15, %c0_10] : memref<4x8x8xbf16, #tpu.memory_space<vmem>>, vector<4x8x8xbf16>
    %c0_11 = arith.constant 0 : index
    %c0_12 = arith.constant 0 : index
    %c0_13 = arith.constant 0 : index
    %17 = vector.load %arg17[%c0_11, %c0_12, %c0_13] : memref<4x8x8xbf16, #tpu.memory_space<vmem>>, vector<4x8x8xbf16>
    %c0_14 = arith.constant 0 : index
    %c0_15 = arith.constant 0 : index
    %c0_16 = arith.constant 0 : index
    %18 = vector.load %arg18[%c0_14, %c0_15, %c0_16] : memref<4x8x8xbf16, #tpu.memory_space<vmem>>, vector<4x8x8xbf16>
    "tpu.trace_start"() <{level = 10 : i32, message = "hqd,hkd->hqk"}> : () -> ()
    %cst_17 = arith.constant dense<0.000000e+00> : vector<4x8x8xf32>
    %19 = tpu.matmul %16, %17, %cst_17 {dimension_numbers = #tpu.dot_dimension_numbers<[2], [2], [1], [1], [0, 0, 0, 1, 1, 1], [0], [0]>} : vector<4x8x8xbf16>, vector<4x8x8xbf16>, vector<4x8x8xf32> -> vector<4x8x8xf32>
    "tpu.trace_stop"() : () -> ()
    %20 = vector.shape_cast %12 : vector<1x8xf32> to vector<1x1x8xf32>
    %21 = vector.broadcast %20 : vector<1x1x8xf32> to vector<4x8x8xf32>
    %22 = arith.addf %19, %21 : vector<4x8x8xf32>
    %cst_18 = arith.constant dense<0xFF800000> : vector<4x8xf32>
    %23 = vector.multi_reduction <maximumf>, %22, %cst_18 [2] : vector<4x8x8xf32> to vector<4x8xf32>
    %24 = vector.shape_cast %23 : vector<4x8xf32> to vector<4x8x1xf32>
    %25 = vector.broadcast %24 : vector<4x8x1xf32> to vector<4x8x8xf32>
    %26 = arith.subf %22, %25 : vector<4x8x8xf32>
    %27 = math.exp %26 : vector<4x8x8xf32>
    %cst_19 = arith.constant dense<0.000000e+00> : vector<4x8xf32>
    %28 = vector.multi_reduction <add>, %27, %cst_19 [2] : vector<4x8x8xf32> to vector<4x8xf32>
    %29 = vector.shape_cast %28 : vector<4x8xf32> to vector<4x8x1xf32>
    %30 = tpu.reciprocal %29 {approx = true} : vector<4x8x1xf32> -> vector<4x8x1xf32>
    %31 = arith.truncf %27 : vector<4x8x8xf32> to vector<4x8x8xbf16>
    "tpu.trace_start"() <{level = 10 : i32, message = "hqk,hkd->hqd"}> : () -> ()
    %cst_20 = arith.constant dense<0.000000e+00> : vector<4x8x8xf32>
    %32 = tpu.matmul %31, %18, %cst_20 {dimension_numbers = #tpu.dot_dimension_numbers<[2], [1], [1], [2], [0, 0, 0, 1, 1, 2], [0], [0]>} : vector<4x8x8xbf16>, vector<4x8x8xbf16>, vector<4x8x8xf32> -> vector<4x8x8xf32>
    "tpu.trace_stop"() : () -> ()
    %33 = vector.broadcast %30 : vector<4x8x1xf32> to vector<4x8x8xf32>
    %34 = arith.mulf %32, %33 : vector<4x8x8xf32>
    %35 = arith.truncf %34 : vector<4x8x8xf32> to vector<4x8x8xbf16>
    %c0_21 = arith.constant 0 : index
    %c0_22 = arith.constant 0 : index
    %c0_23 = arith.constant 0 : index
    %36 = vector.load %arg8[%c0_21, %c0_22, %c0_23] : memref<4x8x32xbf16, #tpu.memory_space<vmem>>, vector<4x8x32xbf16>
    "tpu.trace_start"() <{level = 10 : i32, message = "hqd,hde->hqe"}> : () -> ()
    %cst_24 = arith.constant dense<0.000000e+00> : vector<4x8x32xf32>
    %37 = tpu.matmul %35, %36, %cst_24 {dimension_numbers = #tpu.dot_dimension_numbers<[2], [1], [1], [2], [0, 0, 0, 1, 1, 2], [0], [0]>} : vector<4x8x8xbf16>, vector<4x8x32xbf16>, vector<4x8x32xf32> -> vector<4x8x32xf32>
    "tpu.trace_stop"() : () -> ()
    %cst_25 = arith.constant dense<0.000000e+00> : vector<8x32xf32>
    %38 = vector.multi_reduction <add>, %37, %cst_25 [0] : vector<4x8x32xf32> to vector<8x32xf32>
    %39 = arith.addf %5, %38 : vector<8x32xf32>
    %c0_26 = arith.constant 0 : index
    %c0_27 = arith.constant 0 : index
    %40 = vector.load %arg9[%c0_26, %c0_27] : memref<1x32xf32, #tpu.memory_space<vmem>>, vector<1x32xf32>
    %c0_28 = arith.constant 0 : index
    %c0_29 = arith.constant 0 : index
    %41 = vector.load %arg10[%c0_28, %c0_29] : memref<1x32xf32, #tpu.memory_space<vmem>>, vector<1x32xf32>
    %cst_30 = arith.constant dense<0.000000e+00> : vector<8xf32>
    %42 = vector.multi_reduction <add>, %39, %cst_30 [1] : vector<8x32xf32> to vector<8xf32>
    %43 = vector.shape_cast %42 : vector<8xf32> to vector<8x1xf32>
    %cst_31 = arith.constant 3.200000e+01 : f32
    %44 = vector.broadcast %cst_31 : f32 to vector<8x1xf32>
    %45 = arith.divf %43, %44 : vector<8x1xf32>
    %46 = vector.broadcast %45 : vector<8x1xf32> to vector<8x32xf32>
    %47 = arith.subf %39, %46 : vector<8x32xf32>
    %48 = arith.mulf %47, %47 : vector<8x32xf32>
    %cst_32 = arith.constant dense<0.000000e+00> : vector<8xf32>
    %49 = vector.multi_reduction <add>, %48, %cst_32 [1] : vector<8x32xf32> to vector<8xf32>
    %50 = vector.shape_cast %49 : vector<8xf32> to vector<8x1xf32>
    %cst_33 = arith.constant 3.200000e+01 : f32
    %51 = vector.broadcast %cst_33 : f32 to vector<8x1xf32>
    %52 = arith.divf %50, %51 : vector<8x1xf32>
    %53 = vector.broadcast %45 : vector<8x1xf32> to vector<8x32xf32>
    %54 = arith.subf %39, %53 : vector<8x32xf32>
    %cst_34 = arith.constant 9.99999974E-6 : f32
    %55 = vector.broadcast %cst_34 : f32 to vector<8x1xf32>
    %56 = arith.addf %52, %55 : vector<8x1xf32>
    %57 = math.rsqrt %56 : vector<8x1xf32>
    %58 = vector.broadcast %57 : vector<8x1xf32> to vector<8x32xf32>
    %59 = arith.mulf %54, %58 : vector<8x32xf32>
    %60 = vector.broadcast %40 : vector<1x32xf32> to vector<8x32xf32>
    %61 = arith.mulf %59, %60 : vector<8x32xf32>
    %62 = vector.broadcast %41 : vector<1x32xf32> to vector<8x32xf32>
    %63 = arith.addf %61, %62 : vector<8x32xf32>
    %64 = arith.truncf %63 : vector<8x32xf32> to vector<8x32xbf16>
    %cst_35 = arith.constant 0.000000e+00 : f32
    %65 = vector.broadcast %cst_35 : f32 to vector<8x32xf32>
    %c0_36 = arith.constant 0 : index
    %c0_37 = arith.constant 0 : index
    %66 = vector.load %arg11[%c0_36, %c0_37] : memref<32x128xbf16, #tpu.memory_space<vmem>>, vector<32x128xbf16>
    %cst_38 = arith.constant dense<0.000000e+00> : vector<8x128xf32>
    %67 = tpu.matmul %64, %66, %cst_38 {dimension_numbers = #tpu.dot_dimension_numbers<[1], [0], [0], [1], [0, 0, 1, 1], [], []>} : vector<8x32xbf16>, vector<32x128xbf16>, vector<8x128xf32> -> vector<8x128xf32>
    %c0_39 = arith.constant 0 : index
    %c0_40 = arith.constant 0 : index
    %68 = vector.load %arg12[%c0_39, %c0_40] : memref<1x128xf32, #tpu.memory_space<vmem>>, vector<1x128xf32>
    %69 = vector.broadcast %68 : vector<1x128xf32> to vector<8x128xf32>
    %70 = arith.addf %67, %69 : vector<8x128xf32>
    %cst_41 = arith.constant 5.000000e-01 : f32
    %71 = vector.broadcast %cst_41 : f32 to vector<8x128xf32>
    %72 = arith.mulf %71, %70 : vector<8x128xf32>
    %cst_42 = arith.constant 4.471500e-02 : f32
    %73 = vector.broadcast %cst_42 : f32 to vector<8x128xf32>
    %74 = arith.mulf %73, %70 : vector<8x128xf32>
    %75 = arith.mulf %74, %70 : vector<8x128xf32>
    %76 = arith.mulf %75, %70 : vector<8x128xf32>
    %77 = arith.addf %70, %76 : vector<8x128xf32>
    %cst_43 = arith.constant 0.797884583 : f32
    %78 = vector.broadcast %cst_43 : f32 to vector<8x128xf32>
    %79 = arith.mulf %78, %77 : vector<8x128xf32>
    %80 = math.tanh %79 : vector<8x128xf32>
    %cst_44 = arith.constant 1.000000e+00 : f32
    %81 = vector.broadcast %cst_44 : f32 to vector<8x128xf32>
    %82 = arith.addf %81, %80 : vector<8x128xf32>
    %83 = arith.mulf %72, %82 : vector<8x128xf32>
    %84 = arith.truncf %83 : vector<8x128xf32> to vector<8x128xbf16>
    %c0_45 = arith.constant 0 : index
    %c0_46 = arith.constant 0 : index
    %85 = vector.load %arg13[%c0_45, %c0_46] : memref<128x32xbf16, #tpu.memory_space<vmem>>, vector<128x32xbf16>
    %cst_47 = arith.constant dense<0.000000e+00> : vector<8x32xf32>
    %86 = tpu.matmul %84, %85, %cst_47 {dimension_numbers = #tpu.dot_dimension_numbers<[1], [0], [0], [1], [0, 0, 1, 1], [], []>} : vector<8x128xbf16>, vector<128x32xbf16>, vector<8x32xf32> -> vector<8x32xf32>
    %87 = arith.addf %65, %86 : vector<8x32xf32>
    %c0_48 = arith.constant 0 : index
    %c0_49 = arith.constant 0 : index
    %88 = vector.load %arg14[%c0_48, %c0_49] : memref<1x32xf32, #tpu.memory_space<vmem>>, vector<1x32xf32>
    %89 = vector.broadcast %88 : vector<1x32xf32> to vector<8x32xf32>
    %90 = arith.addf %87, %89 : vector<8x32xf32>
    %91 = arith.addf %39, %90 : vector<8x32xf32>
    %92 = arith.truncf %91 : vector<8x32xf32> to vector<8x32xbf16>
    %c0_50 = arith.constant 0 : index
    %c0_51 = arith.constant 0 : index
    %c0_52 = arith.constant 0 : index
    %93 = vector.load %arg15[%c0_50, %c0_51, %c0_52] : memref<1x8x32xbf16, #tpu.memory_space<vmem>>, vector<1x8x32xbf16>
    %94 = vector.shape_cast %93 : vector<1x8x32xbf16> to vector<8x32xbf16>
    %95 = vector.shape_cast %92 : vector<8x32xbf16> to vector<1x8x32xbf16>
    tpu.vector_store %arg15[%c0_50, %c0_51, %c0_52], %95 {strides = array<i32>} : memref<1x8x32xbf16, #tpu.memory_space<vmem>>, vector<1x8x32xbf16>,
    return
  }
  func.func @transform_0(%arg0: i32, %arg1: i32) -> (i32, i32, i32) {
    %c0_i32 = arith.constant 0 : i32
    %c0_i32_0 = arith.constant 0 : i32
    return %arg0, %arg1, %c0_i32 : i32, i32, i32
  }
  func.func @transform_1(%arg0: i32, %arg1: i32) -> (i32, i32, i32) {
    %c0_i32 = arith.constant 0 : i32
    %c0_i32_0 = arith.constant 0 : i32
    %c0_i32_1 = arith.constant 0 : i32
    return %arg0, %c0_i32, %c0_i32_0 : i32, i32, i32
  }
  func.func @transform_2(%arg0: i32, %arg1: i32) -> (i32, i32, i32) {
    %c0_i32 = arith.constant 0 : i32
    %c0_i32_0 = arith.constant 0 : i32
    %c0_i32_1 = arith.constant 0 : i32
    return %arg0, %c0_i32, %c0_i32_0 : i32, i32, i32
  }
  func.func @transform_3(%arg0: i32, %arg1: i32) -> (i32, i32) {
    %c0_i32 = arith.constant 0 : i32
    %c0_i32_0 = arith.constant 0 : i32
    %c0_i32_1 = arith.constant 0 : i32
    return %c0_i32, %c0_i32_0 : i32, i32
  }
  func.func @transform_4(%arg0: i32, %arg1: i32) -> (i32, i32) {
    %c0_i32 = arith.constant 0 : i32
    %c0_i32_0 = arith.constant 0 : i32
    %c0_i32_1 = arith.constant 0 : i32
    return %c0_i32, %c0_i32_0 : i32, i32
  }
  func.func @transform_5(%arg0: i32, %arg1: i32) -> (i32, i32) {
    %c0_i32 = arith.constant 0 : i32
    %c0_i32_0 = arith.constant 0 : i32
    %c0_i32_1 = arith.constant 0 : i32
    return %c0_i32, %c0_i32_0 : i32, i32
  }
  func.func @transform_6(%arg0: i32, %arg1: i32) -> (i32, i32, i32) {
    %c0_i32 = arith.constant 0 : i32
    %c0_i32_0 = arith.constant 0 : i32
    %c0_i32_1 = arith.constant 0 : i32
    %c0_i32_2 = arith.constant 0 : i32
    return %c0_i32, %c0_i32_0, %c0_i32_1 : i32, i32, i32
  }
  func.func @transform_7(%arg0: i32, %arg1: i32) -> (i32, i32) {
    %c0_i32 = arith.constant 0 : i32
    %c0_i32_0 = arith.constant 0 : i32
    %c0_i32_1 = arith.constant 0 : i32
    return %c0_i32, %c0_i32_0 : i32, i32
  }
  func.func @transform_8(%arg0: i32, %arg1: i32) -> (i32, i32) {
    %c0_i32 = arith.constant 0 : i32
    %c0_i32_0 = arith.constant 0 : i32
    %c0_i32_1 = arith.constant 0 : i32
    return %c0_i32, %c0_i32_0 : i32, i32
  }
  func.func @transform_9(%arg0: i32, %arg1: i32) -> (i32, i32) {
    %c0_i32 = arith.constant 0 : i32
    %c0_i32_0 = arith.constant 0 : i32
    %c0_i32_1 = arith.constant 0 : i32
    return %c0_i32, %c0_i32_0 : i32, i32
  }
  func.func @transform_10(%arg0: i32, %arg1: i32) -> (i32, i32) {
    %c0_i32 = arith.constant 0 : i32
    %c0_i32_0 = arith.constant 0 : i32
    %c0_i32_1 = arith.constant 0 : i32
    return %c0_i32, %c0_i32_0 : i32, i32
  }
  func.func @transform_11(%arg0: i32, %arg1: i32) -> (i32, i32) {
    %c0_i32 = arith.constant 0 : i32
    %c0_i32_0 = arith.constant 0 : i32
    %c0_i32_1 = arith.constant 0 : i32
    return %c0_i32, %c0_i32_0 : i32, i32
  }
  func.func @transform_12(%arg0: i32, %arg1: i32) -> (i32, i32) {
    %c0_i32 = arith.constant 0 : i32
    %c0_i32_0 = arith.constant 0 : i32
    %c0_i32_1 = arith.constant 0 : i32
    return %c0_i32, %c0_i32_0 : i32, i32
  }
  func.func @transform_13(%arg0: i32, %arg1: i32) -> (i32, i32, i32) {
    %c0_i32 = arith.constant 0 : i32
    %c0_i32_0 = arith.constant 0 : i32
    return %arg0, %arg1, %c0_i32 : i32, i32, i32
  }
}

</mosaic_0001>

<bundles_post_ra>
// kernel: tpu_custom_call.1
= control target key start
LH: loop header
LB: loop body
LE: loop exit
PB: predicated region body
PF: predicated region fallthrough
CT: control target
= control target key end

     0   :  { %18 = vsyncpa [#allocation6], 0  ;;  %s2529_s0 = inlined_call_operand.vmem [shape: bf16[2,8,32], index: 0, kind: input, shape index: {}]   ;;  %s2530_s1 = inlined_call_operand.vmem [shape: bf16[2,8,32], index: 1, kind: input, shape index: {}]   ;;  %s2531_s2 = inlined_call_operand.vmem [shape: f32[2,1,8], index: 2, kind: input, shape index: {}]   ;;  %s2532_s3 = inlined_call_operand.vmem [shape: f32[1,32], index: 3, kind: input, shape index: {}]   ;;  %s2533_s4 = inlined_call_operand.vmem [shape: f32[1,32], index: 4, kind: input, shape index: {}]   ;;  %s2534_s5 = inlined_call_operand.vmem [shape: bf16[32,96], index: 5, kind: input, shape index: {}]   ;;  %s2535_s6 = inlined_call_operand.vmem [shape: bf16[4,8,32], index: 6, kind: input, shape index: {}]   ;;  %s2536_s7 = inlined_call_operand.vmem [shape: f32[1,32], index: 7, kind: input, shape index: {}]   ;;  %s2537_s8 = inlined_call_operand.vmem [shape: f32[1,32], index: 8, kind: input, shape index: {}]   ;;  %s2538_s9 = inlined_call_operand.vmem [shape: bf16[32,128], index: 9, kind: input, shape index: {}]   ;;  %s2539_s10 = inlined_call_operand.vmem [shape: f32[1,128], index: 10, kind: input, shape index: {}]   ;;  %s2540_s11 = inlined_call_operand.vmem [shape: bf16[128,32], index: 11, kind: input, shape index: {}]   ;;  %s2541_s12 = inlined_call_operand.vmem [shape: f32[1,32], index: 12, kind: input, shape index: {}]   ;;  %s2542_s13 = inlined_call_operand.hbm [shape: bf16[2,8,32], index: 13, kind: output, shape index: {}]  }
   0x1   :  { %20 = vsyncpa [#allocation6 + $0x1], 0  ;;  %s2199_s25 = smov 0   ;;  %s2201_s26 = smov 0  }
   0x2   :  { %s2203_s27 = smov 0   ;;  %s2205_s28 = smov 0  }
   0x3   :  { %s2207_s29 = smov 0   ;;  %s2209_s30 = smov 0  }
   0x4 LB: > { %2546 = sst [smem:[#allocation8_spill]] %s2106_s27  ;;  %s1722_s14 = sadd.s32 4294967295, %s2118_s30   ;;  %s2118_s30 = sphi %s2209_s30, %s26_s30   ;;  %s2114_s29 = sphi %s2207_s29, %s2555_s29   ;;  %s2110_s28 = sphi %s2205_s28, %s2554_s28   ;;  %s2106_s27 = sphi %s2203_s27, %s2553_s27   ;;  %s2102_s26 = sphi %s2201_s26, %s2557_s26   ;;  %s2098_s25 = sphi %s2199_s25, %s2556_s25  }
   0x5   : > { %2547 = sst [smem:[#allocation9_spill]] %s2114_s29  ;;  %s1723_s15 = sadd.s32 4294967294, %s2118_s30  }
   0x6   : > { %s38_s16 = sadd.s32 1, %s2114_s29  ;;  %s337_s17 = sadd.s32 1, %s2106_s27 }
   0x7   : > { %p40_p0 = scmp.ge.s32.totalorder %s38_s16, 2  ;;  %p347_p1 = scmp.ne.s32.totalorder %s2106_s27, %s2102_s26 }
   0x8   : > { %p348_p2 = scmp.eq.s32.totalorder %s1722_s14, 1  ;;  %p353_p3 = scmp.ne.s32.totalorder %s2102_s26, %s2098_s25 }
   0x9   : > { %s2559_s16 = smov (%p40_p0, %s38_s16), 0  ;;  %p354_p5 = scmp.eq.s32.totalorder %s1723_s15, 1 }
   0xa   : > { %2548 = sst [smem:[#allocation10_spill]] %s2559_s16  ;;  %p2239_p4 = por %p348_p2, %p347_p1 }
   0xb   : > { %s332_s19 = ssub.s32 %s2114_s29, %s2559_s16  ;;  %p1726_p6 = scmp.ge.s32.totalorder %s2118_s30, 1 }
   0xc   : > { %p335_p7 = scmp.eq.s32.totalorder %s332_s19, 0  ;;  %p2246_p8 = por %p354_p5, %p353_p3 }
   0xd   : > { %p425_p9 = scmp.lt.s32.totalorder %s2118_s30, 3 }
   0xe   : > { %s2252_s21 = scalar_select %p335_p7, %s2106_s27, %s337_s17  }
   0xf   : > { %p426_p10 = pnand %p1726_p6, %p425_p9 }
  0x10   : > { %2551 = sst [smem:[#allocation11_spill]] %s2252_s21  ;;  %p478_p11 = scmp.lt.s32.totalorder (!%p426_p10), %s2110_s28, 1  ;;  %vm501_vm0 = vcmask (!%p426_p10), 261120   ;;  %v2006_v3 = vld [vmem:[%s2534_s5] sm:$0xff] (!%p426_p10)   ;;  %v2007_v4 = vld [vmem:[%s2534_s5 + $0x8] sm:$0xff] (!%p426_p10)   ;;  %v2122_v10 = vmov (!%p426_p10), 0.0   ;;  %v767_v61 = vlaneseq (!%p426_p10) }
  0x11   : > { %429 = sbr.rel (%p426_p10) target bundleno = 2305 (0x901), region = 72  ;;  %s2120_s16 = smov (!%p426_p10), 96   ;;  %1819 = vmatprep.subr.bf16.mxu1 (!%p426_p10), %v2122_v10  ;;  %vm2123_vm1 = vmmov (!%p426_p10), 0   ;;  %1849 = vmatprep.subr.bf16.mxu0 (!%p426_p10), %v2122_v10  ;;  %v1730_v15 = vld [vmem:[%s2532_s3] ss:$0 sm:$0xff] (!%p426_p10)  ;;  %vm686_vm2 = vcmask (!%p426_p10), 60416  }
  0x12   : > { %592 = vrot.lane.b32.xlu1 (!%p426_p10), %v2006_v3, %s2120_s16  ;;  %s2121_s27 = smov (!%p426_p10), 64   ;;  %1823 = vmatprep.mubr.msk.bf16.mxu1 (!%p426_p10), %vm2123_vm1, %v2122_v10  ;;  %v1731_v17 = vld [vmem:[%s2533_s4] ss:$0 sm:$0xff] (!%p426_p10)  ;;  %s2125_s14 = smov (!%p426_p10), 120   ;;  %vm772_vm3 = vcmask (!%p426_p10), 64512   ;;  %vm1004_vm4 = vcmask (!%p426_p10), 1043456  }
  0x13   : > { %1820 = vmatpush3.bf16.msra.mxu1 (!%p426_p10), %v2006_v3  ;;  %1851 = vmatprep.mubr.msk.bf16.mxu0 (!%p426_p10), %vm2123_vm1, %v2122_v10  ;;  %v768_v63 = vshrl.u32 (!%p426_p10), %v767_v61, 7  ;;  %vm1611_vm6 = vcmask (!%p426_p10), 257024  }
  0x14   : > { %1821 = vmatprep.subr.bf16.mxu1 (!%p426_p10), %v2122_v10 }
  0x16   : > { %594 = vrot.lane.b32.xlu1 (!%p426_p10), %v2007_v4, %s2120_s16 }
  0x17   : > { %1822 = vmatpush3.bf16.msra.mxu1 (!%p426_p10), %v2007_v4 }
  0x18   : > { %s2256_s22 = scalar_select %p478_p11, %s2110_s28, 1  ;;  %1827 = vmatprep.subr.bf16.mxu1 %v2122_v10 }
  0x1a   : > { %s1728_s23 = sshll.u32 %s2256_s22, 2  ;;  %641 = vrot.lane.b32.xlu1 %v2007_v4, %s2121_s27  ;;  %s491_s29 = scalar_lea.vmem %s2531_s2, %s2256_s22 }
  0x1b   : > { %s488_s15 = scalar_lea.vmem %s2530_s1, %s1728_s23  ;;  %v746_v62 = vld [vmem:[%s491_s29] sm:$0x1]  ;;  %s484_s21 = scalar_lea.vmem %s2529_s0, %s1728_s23 }
  0x1c   : > { %v497_v0 = vld [vmem:[%s488_s15] sm:$0xf]  ;;  %s2126_s15 = smov 112   ;;  %vm747_vm5 = vcmp.gt.f32.partialorder %v746_v62, 0.0  ;;  %s1768_s29 = sshll.u32 %s2110_s28, 6 }
  0x1d   : > { %v498_v1 = vunpack.c.l.bf16 %v497_v0  ;;  %v769_v0 = vsub.s32 0, %v768_v63  ;;  %s2482_s24 = scalar_lea.hbm %s2542_s13, %s1768_s29 }
  0x1f   : > { %v502_v2 = vsel %vm501_vm0, %v498_v1, 0.0 }
  0x20   : > { %503 = vadd.xlane.f32.xlu0 %v502_v2 }
  0x84   : > { %v593_v19 = vpop.permute.xlu1 %592 }
  0x88   : > { %v595_v22 = vpop.permute.xlu1 %594 }
  0x8c   : > { %v642_v24 = vpop.permute.xlu1 %641 }
  0xad   : > { %v504_v5 = vpop.xlane.xlu0 %503 }
  0xae   : > { %v506_v6 = vmul.f32 0.03125, %v504_v5 }
  0xb0   : > { %v507_v7 = vsub.f32 %v498_v1, %v506_v6  ;;  %v2127_v1 = vmov -1e+09  }
  0xb1   : > { %v748_v2 = vsel %vm747_vm5, 0.0, %v2127_v1  ;;  %v1195_v1 = vld [vmem:[%s2535_s6 + $0x4] sm:$0xf] }
  0xb2   : > { %v508_v8 = vmul.f32 %v507_v7, %v507_v7 }
  0xb4   : > { %v509_v9 = vsel %vm501_vm0, %v508_v8, 0.0 }
  0xb5   : > { %510 = vadd.xlane.f32.xlu0 %v509_v9 }
  0xcb   : > { %639 = vrot.lane.b32.xlu0 %v2006_v3, %s2121_s27  ;;  %s2124_s27 = smov 104   ;;  %v770_v3 = vrot.slane %v748_v2, %v769_v0  ;;  %v1248_v2 = vsel %vm1004_vm4, %v1195_v1, 0 }
 0x142   : > { %v511_v11 = vpop.xlane.xlu0 %510 }
 0x143   : > { %v512_v12 = vmul.f32 0.03125, %v511_v11 }
 0x145   : > { %v513_v13 = vadd.f32 1e-05, %v512_v12 }
 0x146   : > { %v640_v23 = vpop.permute.xlu0 %639 }
 0x147   : > { %2018 = vrsqrt.f32 %v513_v13 }
 0x151   : > { %v2019_v14 = vpop.eup %2018 }
 0x152   : > { %v515_v16 = vmul.f32 %v2019_v14, %v507_v7 }
 0x154   : > { %v522_v18 = vmul.f32 %v1730_v15, %v515_v16 }
 0x156   : > { %v529_v20 = vadd.f32 %v1731_v17, %v522_v18 }
 0x158   : > { %v530_v21 = vpack.c.bf16 %v529_v20, %v529_v20 }
 0x15a   : > { %1824 = vmatmul.mubr.msk.bf16.vlgmr.msra.gmra.mrb[0].mxu1 %vm501_vm0, %v530_v21 }
 0x15b   : > { %1828 = vmatpush3.bf16.msra.mxu1 %v593_v19  ;;  %1831 = vmatprep.mubr.msk.bf16.mxu1 %vm2123_vm1, %v2122_v10 }
 0x15c   : > { %1829 = vmatprep.subr.bf16.mxu1 %v2122_v10 }
 0x15f   : > { %1830 = vmatpush3.bf16.msra.mxu1 %v595_v22 }
 0x160   : > { %1835 = vmatprep.subr.bf16.mxu1 %v2122_v10 }
 0x162   : > { %1832 = vmatmul.mubr.msk.bf16.vlgmr.msra.gmra.mrb[4].mxu1 %vm501_vm0, %v530_v21 }
 0x163   : > { %1836 = vmatpush3.bf16.msra.mxu1 %v640_v23  ;;  %1839 = vmatprep.mubr.msk.bf16.mxu1 %vm2123_vm1, %v2122_v10 }
 0x164   : > { %1837 = vmatprep.subr.bf16.mxu1 %v2122_v10 }
 0x167   : > { %1838 = vmatpush3.bf16.msra.mxu1 %v642_v24 }
 0x168   : > { %1843 = vmatprep.subr.bf16.mxu1 %v2122_v10 }
 0x16a   : > { %1840 = vmatmul.mubr.msk.bf16.vlgmr.msra.gmra.mrb[8].mxu1 %vm501_vm0, %v530_v21 }
 0x16b   : > { %1845 = vmatprep.mubr.msk.bf16.mxu1 %vm2123_vm1, %v2122_v10 }
 0x22d   : > { %v584_v25 = vpop.f32.mrb[0].mxu1 }
 0x22e   : > { %v590_v26 = vmul.f32 0.35355338, %v584_v25  ;;  %v1825_v27 = vpop.f32.mrb[1].mxu1 }
 0x22f   : > { %v587_v28 = vpop.f32.mrb[2].mxu1 }
 0x230   : > { %v591_v29 = vpack.c.bf16 %v590_v26, %v590_v26  ;;  %v1826_v30 = vpop.f32.mrb[3].mxu1 }
 0x232   : > { %687 = vst.msk [vmem:[#allocation2] sm:$0xf] %vm686_vm2, %v591_v29  ;;  %729 = vrot.lane.b32.xlu0 %v591_v29, %s2124_s27  ;;  %693 = vrot.lane.b32.xlu1 %v591_v29, %s2125_s14 }
 0x235   : > { %v632_v31 = vpop.f32.mrb[4].mxu1 }
 0x236   : > { %v638_v32 = vpack.c.bf16 %v632_v31, %v632_v31  ;;  %v1833_v33 = vpop.f32.mrb[5].mxu1 }
 0x237   : > { %v635_v34 = vpop.f32.mrb[6].mxu1 }
 0x238   : > { %688 = vst.msk [vmem:[#allocation3] sm:$0xf] %vm686_vm2, %v638_v32  ;;  %701 = vrot.lane.b32.xlu1 %v638_v32, %s2125_s14  ;;  %v1834_v35 = vpop.f32.mrb[7].mxu1 }
 0x239   : > { %v754_v43 = vld [vmem:[#allocation2] sm:$0xf] }
 0x23c   : > { %719 = vrot.lane.b32.xlu1 %v638_v32, %s2126_s15 }
 0x23d   : > { %v679_v36 = vpop.f32.mrb[8].mxu1 }
 0x23e   : > { %v2305_v37 = vpack.c.bf16 %v679_v36, %v679_v36  ;;  %v1841_v38 = vpop.f32.mrb[9].mxu1 }
 0x23f   : > { %v682_v39 = vpop.f32.mrb[10].mxu1  ;;  %v758_v40 = vld [vmem:[#allocation3] sm:$0xf] }
 0x240   : > { %689 = vst.msk [vmem:[#allocation4] sm:$0xf] %vm686_vm2, %v2305_v37  ;;  %734 = vrot.lane.b32.xlu1 %v638_v32, %s2124_s27  ;;  %v1842_v41 = vpop.f32.mrb[11].mxu1  ;;  %v777_v42 = vsel %vm772_vm3, %v758_v40, 0 }
 0x241   : > { %1844 = vmatpush3.bf16.xpose.msra.mxu1 %v777_v42 }
 0x242   : > { %1855 = vmatprep.subr.bf16.mxu1 %v2122_v10 }
 0x244   : > { %714 = vrot.lane.b32.xlu1 %v591_v29, %s2126_s15 }
 0x247   : > { %v762_v57 = vld [vmem:[#allocation4] sm:$0xf] }
 0x248   : > { %1846 = vmatmul.mubr.msk.bf16.vlgmr.msra.gmra.mrb[12].mxu1 %vm772_vm3, %v754_v43  ;;  %v1006_v59 = vsel %vm1004_vm4, %v762_v57, 0 }
 0x249   : > { %1857 = vmatprep.mubr.msk.bf16.mxu1 %vm2123_vm1, %v2122_v10 }
 0x2a4   : > { %v694_v44 = vpop.permute.xlu1 %693  ;;  %v730_v45 = vpop.permute.xlu0 %729 }
 0x2a5   : > { %697 = vst.msk [vmem:[#allocation2 + $0x4] sm:$0xf] %vm686_vm2, %v694_v44  ;;  %733 = vst.msk [vmem:[#allocation2 + $0xc] sm:$0xf] %vm686_vm2, %v730_v45 }
 0x2aa   : > { %v702_v46 = vpop.permute.xlu1 %701 }
 0x2ab   : > { %705 = vst.msk [vmem:[#allocation3 + $0x4] sm:$0xf] %vm686_vm2, %v702_v46 }
 0x2ac   : > { %v755_v54 = vld [vmem:[#allocation2 + $0x4] sm:$0xf]  ;;  %v757_v60 = vld [vmem:[#allocation2 + $0xc] sm:$0xf] }
 0x2ae   : > { %v720_v47 = vpop.permute.xlu1 %719 }
 0x2af   : > { %723 = vst.msk [vmem:[#allocation3 + $0x8] sm:$0xf] %vm686_vm2, %v720_v47 }
 0x2b2   : > { %v735_v48 = vpop.permute.xlu1 %734  ;;  %v759_v49 = vld [vmem:[#allocation3 + $0x4] sm:$0xf] }
 0x2b3   : > { %738 = vst.msk [vmem:[#allocation3 + $0xc] sm:$0xf] %vm686_vm2, %v735_v48  ;;  %v823_v50 = vsel %vm772_vm3, %v759_v49, 0 }
 0x2b4   : > { %1850 = vmatpush3.bf16.xpose.msra.mxu0 %v823_v50 }
 0x2b5   : > { %1861 = vmatprep.subr.bf16.mxu0 %v2122_v10 }
 0x2b6   : > { %v715_v51 = vpop.permute.xlu1 %714  ;;  %v760_v52 = vld [vmem:[#allocation3 + $0x8] sm:$0xf] }
 0x2b7   : > { %718 = vst.msk [vmem:[#allocation2 + $0x8] sm:$0xf] %vm686_vm2, %v715_v51  ;;  %v869_v53 = vsel %vm772_vm3, %v760_v52, 0 }
 0x2b8   : > { %1856 = vmatpush3.bf16.xpose.msra.mxu1 %v869_v53  ;;  %v1194_v53 = vld [vmem:[%s2535_s6] sm:$0xf] }
 0x2b9   : > { %1867 = vmatprep.subr.bf16.mxu1 %v2122_v10 }
 0x2ba   : > { %v761_v55 = vld [vmem:[#allocation3 + $0xc] sm:$0xf] }
 0x2bb   : > { %1852 = vmatmul.mubr.msk.bf16.vlgmr.msra.gmra.mrb[0].mxu0 %vm772_vm3, %v755_v54  ;;  %v915_v56 = vsel %vm772_vm3, %v761_v55, 0 }
 0x2bc   : > { %1862 = vmatpush3.bf16.xpose.msra.mxu0 %v915_v56  ;;  %1863 = vmatprep.mubr.msk.bf16.mxu0 %vm2123_vm1, %v2122_v10 }
 0x2bd   : > { %1873 = vmatprep.subr.bf16.mxu0 %v2122_v10 }
 0x2be   : > { %v756_v58 = vld [vmem:[#allocation2 + $0x8] sm:$0xf] }
 0x2bf   : > { %1858 = vmatmul.mubr.msk.bf16.vlgmr.msra.gmra.mrb[16].mxu1 %vm772_vm3, %v756_v58 }
 0x2c0   : > { %1868 = vmatpush3.bf16.msra.mxu1 %v1006_v59  ;;  %1869 = vmatprep.mubr.msk.bf16.mxu1 %vm2123_vm1, %v2122_v10  ;;  %v1202_v59 = vsel %vm1004_vm4, %v1194_v53, 0 }
 0x2c1   : > { %1879 = vmatprep.subr.bf16.mxu1 %v2122_v10 }
 0x2c3   : > { %1864 = vmatmul.mubr.msk.bf16.vlgmr.msra.gmra.mrb[4].mxu0 %vm772_vm3, %v757_v60 }
 0x2c4   : > { %1875 = vmatprep.mubr.msk.bf16.mxu0 %vm2123_vm1, %v2122_v10 }
 0x31b   : > { %v813_v4 = vpop.f32.mrb[12].mxu1 }
 0x31c   : > { %v814_v5 = vadd.f32 %v813_v4, %v770_v3  ;;  %v1847_v6 = vpop.f32.mrb[13].mxu1 }
 0x31d   : > { %v816_v7 = vpop.f32.mrb[14].mxu1 }
 0x31e   : > { %v1848_v8 = vpop.f32.mrb[15].mxu1  ;;  %v957_v9 = vsel %vm772_vm3, %v814_v5, -inf }
 0x31f   : > { %958 = vmax.xlane.f32.xlu1 %v957_v9 }
 0x330   : > { %724 = vrot.lane.b32.xlu1 %v2305_v37, %s2126_s15 }
 0x38e   : > { %v859_v11 = vpop.f32.mrb[0].mxu0 }
 0x38f   : > { %v860_v12 = vadd.f32 %v859_v11, %v770_v3  ;;  %v1853_v13 = vpop.f32.mrb[1].mxu0 }
 0x390   : > { %v862_v14 = vpop.f32.mrb[2].mxu0 }
 0x391   : > { %v1854_v15 = vpop.f32.mrb[3].mxu0  ;;  %v960_v16 = vsel %vm772_vm3, %v860_v12, -inf }
 0x392   : > { %961 = vmax.xlane.f32.xlu0 %v960_v16  ;;  %v905_v17 = vpop.f32.mrb[16].mxu1 }
 0x393   : > { %v906_v18 = vadd.f32 %v905_v17, %v770_v3  ;;  %v1859_v19 = vpop.f32.mrb[17].mxu1 }
 0x394   : > { %v908_v20 = vpop.f32.mrb[18].mxu1 }
 0x395   : > { %v1860_v21 = vpop.f32.mrb[19].mxu1  ;;  %v963_v22 = vsel %vm772_vm3, %v906_v18, -inf }
 0x396   : > { %964 = vmax.xlane.f32.xlu0 %v963_v22  ;;  %v951_v23 = vpop.f32.mrb[4].mxu0 }
 0x397   : > { %v952_v24 = vadd.f32 %v951_v23, %v770_v3  ;;  %v1865_v25 = vpop.f32.mrb[5].mxu0 }
 0x398   : > { %v954_v26 = vpop.f32.mrb[6].mxu0 }
 0x399   : > { %v1866_v27 = vpop.f32.mrb[7].mxu0  ;;  %v966_v28 = vsel %vm772_vm3, %v952_v24, -inf }
 0x39a   : > { %967 = vmax.xlane.f32.xlu1 %v966_v28 }
 0x3ab   : > { %739 = vrot.lane.b32.xlu1 %v2305_v37, %s2124_s27 }
 0x3ac   : > { %v959_v29 = vpop.xlane.xlu1 %958  ;;  %709 = vrot.lane.b32.xlu0 %v2305_v37, %s2125_s14  ;;  %s475_s14 = sand.u32 1, %s2102_s26  }
 0x3ad   : > { %v969_v30 = vsub.f32 %v814_v5, %v959_v29  ;;  %v1196_v5 = vld [vmem:[%s2535_s6 + $0x8] sm:$0xf]  ;;  %s1727_s15 = sshll.u32 %s475_s14, 2  ;;  %s1614_s27 = scalar_lea.sflag [#allocation6], %s475_s14 }
 0x3ae   : > { %s477_s16 = scalar_lea.vmem [#allocation5], %s1727_s15  ;;  %s2128_s15 = smov [#allocation5]  }
 0x3af   : > { %v973_v31 = vmul.f32 1.442695, %v969_v30  ;;  %s2044_s17 = sshll.u32 %s2128_s15, 4  ;;  %s2045_s17 = int_to_ptr.vmem [resolvable:$false] %s2044_s17 }
 0x3b0   : > { %v725_v32 = vpop.permute.xlu1 %724  ;;  %s2046_s19 = scalar_lea.vmem %s2045_s17, 128 }
 0x3b1   : > { %2020 = vpow2.f32 %v973_v31  ;;  %728 = vst.msk [vmem:[#allocation4 + $0x8] sm:$0xf] %vm686_vm2, %v725_v32 }
 0x3b8   : > { %v764_v34 = vld [vmem:[#allocation4 + $0x8] sm:$0xf] }
 0x3b9   : > { %v1098_v36 = vsel %vm1004_vm4, %v764_v34, 0 }
 0x3bb   : > { %v2021_v33 = vpop.eup %2020 }
 0x3bc   : > { %v997_v35 = vpack.c.bf16 %v2021_v33, %v2021_v33  ;;  %v981_v37 = vsel %vm772_vm3, %v2021_v33, 0.0 }
 0x3be   : > { %1870 = vmatmul.mubr.msk.bf16.vlgmr.msra.gmra.mrb[20].mxu1 %vm772_vm3, %v997_v35 }
 0x3bf   : > { %1880 = vmatpush3.bf16.msra.mxu1 %v1098_v36  ;;  %1881 = vmatprep.mubr.msk.bf16.mxu1 %vm2123_vm1, %v2122_v10 }
 0x3c0   : > { %1891 = vmatprep.subr.bf16.mxu1 %v2122_v10 }
 0x3cb   : > { %982 = vadd.xlane.f32.xlu0 %v981_v37 }
 0x41f   : > { %v962_v38 = vpop.xlane.xlu0 %961 }
 0x420   : > { %v970_v39 = vsub.f32 %v860_v12, %v962_v38  ;;  %v1294_v12 = vsel %vm1004_vm4, %v1196_v5, 0 }
 0x422   : > { %v975_v40 = vmul.f32 1.442695, %v970_v39 }
 0x423   : > { %v965_v41 = vpop.xlane.xlu0 %964 }
 0x424   : > { %2022 = vpow2.f32 %v975_v40  ;;  %v971_v42 = vsub.f32 %v906_v18, %v965_v41  ;;  %v1197_v18 = vld [vmem:[%s2535_s6 + $0xc] sm:$0xf] }
 0x425   : > { %v1340_v29 = vsel %vm1004_vm4, %v1197_v18, 0 }
 0x426   : > { %v977_v43 = vmul.f32 1.442695, %v971_v42 }
 0x427   : > { %v968_v44 = vpop.xlane.xlu1 %967  ;;  %v710_v45 = vpop.permute.xlu0 %709 }
 0x428   : > { %2024 = vpow2.f32 %v977_v43  ;;  %v972_v46 = vsub.f32 %v952_v24, %v968_v44  ;;  %713 = vst.msk [vmem:[#allocation4 + $0x4] sm:$0xf] %vm686_vm2, %v710_v45 }
 0x42a   : > { %v979_v47 = vmul.f32 1.442695, %v972_v46 }
 0x42b   : > { %v740_v48 = vpop.permute.xlu1 %739 }
 0x42c   : > { %2026 = vpow2.f32 %v979_v47  ;;  %743 = vst.msk [vmem:[#allocation4 + $0xc] sm:$0xf] %vm686_vm2, %v740_v48 }
 0x42e   : > { %v2023_v49 = vpop.eup %2022 }
 0x42f   : > { %v984_v50 = vsel %vm772_vm3, %v2023_v49, 0.0  ;;  %v763_v51 = vld [vmem:[#allocation4 + $0x4] sm:$0xf]  ;;  %v998_v55 = vpack.c.bf16 %v2023_v49, %v2023_v49 }
 0x430   : > { %985 = vadd.xlane.f32.xlu1 %v984_v50  ;;  %v1052_v52 = vsel %vm1004_vm4, %v763_v51, 0 }
 0x431   : > { %1874 = vmatpush3.bf16.msra.mxu0 %v1052_v52 }
 0x432   : > { %v2025_v54 = vpop.eup %2024  ;;  %1885 = vmatprep.subr.bf16.mxu0 %v2122_v10 }
 0x433   : > { %v987_v56 = vsel %vm772_vm3, %v2025_v54, 0.0  ;;  %v999_v57 = vpack.c.bf16 %v2025_v54, %v2025_v54  ;;  %v765_v58 = vld [vmem:[#allocation4 + $0xc] sm:$0xf] }
 0x434   : > { %988 = vadd.xlane.f32.xlu0 %v987_v56  ;;  %1876 = vmatmul.mubr.msk.bf16.vlgmr.msra.gmra.mrb[8].mxu0 %vm772_vm3, %v998_v55  ;;  %v1144_v60 = vsel %vm1004_vm4, %v765_v58, 0  ;;  %v744_v56 = vld [vmem:[%s484_s21] sm:$0xf]  ;;  %s1628_s21 = sshll.u32 %s477_s16, 4  ;;  %s2484_s21 = int_to_ptr.vmem [resolvable:$true] %s1628_s21 }
 0x435   : > { %1882 = vmatmul.mubr.msk.bf16.vlgmr.msra.gmra.mrb[24].mxu1 %vm772_vm3, %v999_v57  ;;  %1886 = vmatpush3.bf16.msra.mxu0 %v1144_v60  ;;  %v745_v57 = vunpack.c.l.bf16 %v744_v56  ;;  %s2040_s28 = scalar_lea.vmem %s2484_s21, 64  ;;  %p2047_p1 = scmp.lt.s32.totalorder %s2484_s21, %s2045_s17 }
 0x436   : > { %v2027_v61 = vpop.eup %2026  ;;  %1887 = vmatprep.mubr.msk.bf16.mxu0 %vm2123_vm1, %v2122_v10  ;;  %1892 = vmatpush3.bf16.msra.mxu1 %v1202_v59  ;;  %p2041_p12 = scmp.ne.s32.totalorder %s2484_s21, %s2040_s28  ;;  %p2048_p2 = scmp.lt.s32.totalorder %s2046_s19, %s2040_s28 }
 0x437   : > { %v990_v62 = vsel %vm772_vm3, %v2027_v61, 0.0  ;;  %1893 = vmatprep.mubr.msk.bf16.mxu1 %vm2123_vm1, %v2122_v10  ;;  %1897 = vmatprep.subr.bf16.mxu0 %v2122_v10  ;;  %v1000_v63 = vpack.c.bf16 %v2027_v61, %v2027_v61 }
 0x438   : > { %991 = vadd.xlane.f32.xlu0 %v990_v62  ;;  %1903 = vmatprep.subr.bf16.mxu1 %v2122_v10  ;;  %p2042_p13 = pnand %p2041_p12, %p2239_p4  ;;  %p2049_p3 = por %p2048_p2, %p2047_p1 }
 0x43a   : > { %p2043_p0 = pneg %p2042_p13 }
 0x43c   : > { %1888 = vmatmul.mubr.msk.bf16.vlgmr.msra.gmra.mrb[12].mxu0 %vm772_vm3, %v1000_v63  ;;  %p2050_p5 = pnand %p2049_p3, %p2043_p0 }
 0x43d   : > { %1899 = vmatprep.mubr.msk.bf16.mxu0 %vm2123_vm1, %v2122_v10  ;;  %1898 = vmatpush3.bf16.msra.mxu0 %v1248_v2 }
 0x43e   : > { %1909 = vmatprep.subr.bf16.mxu0 %v2122_v10 }
 0x458   : > { %v983_v0 = vpop.xlane.xlu0 %982 }
 0x459   : > { %2028 = vrcp.f32 %v983_v0 }
 0x463   : > { %v2029_v3 = vpop.eup %2028 }
 0x491   : > { %v1042_v4 = vpop.f32.mrb[20].mxu1 }
 0x492   : > { %v1186_v6 = vmul.f32 %v2029_v3, %v1042_v4  ;;  %v1871_v7 = vpop.f32.mrb[21].mxu1 }
 0x493   : > { %v1045_v8 = vpop.f32.mrb[22].mxu1  ;;  %v2008_v7 = vld [vmem:[%s2538_s9] sm:$0xff]  }
 0x494   : > { %v1190_v9 = vpack.c.bf16 %v1186_v6, %v1186_v6  ;;  %v1872_v11 = vpop.f32.mrb[23].mxu1  ;;  %v2009_v8 = vld [vmem:[%s2538_s9 + $0x8] sm:$0xff]  }
 0x496   : > { %1894 = vmatmul.mubr.msk.bf16.vlgmr.msra.gmra.mrb[28].mxu1 %vm772_vm3, %v1190_v9  ;;  %v2010_v9 = vld [vmem:[%s2540_s11] sm:$0xff]  }
 0x497   : > { %1904 = vmatpush3.bf16.msra.mxu1 %v1294_v12  ;;  %1905 = vmatprep.mubr.msk.bf16.mxu1 %vm2123_vm1, %v2122_v10 }
 0x498   : > { %1915 = vmatprep.subr.bf16.mxu1 %v2122_v10 }
 0x4bd   : > { %v986_v13 = vpop.xlane.xlu1 %985 }
 0x4be   : > { %2030 = vrcp.f32 %v986_v13 }
 0x4c1   : > { %v989_v14 = vpop.xlane.xlu0 %988 }
 0x4c2   : > { %2032 = vrcp.f32 %v989_v14 }
 0x4c5   : > { %v992_v15 = vpop.xlane.xlu0 %991 }
 0x4c6   : > { %2034 = vrcp.f32 %v992_v15  ;;  %v1752_v15 = vld [vmem:[%s2536_s7] ss:$0 sm:$0xff] }
 0x4c8   : > { %v2031_v16 = vpop.eup %2030 }
 0x4cc   : > { %v2033_v19 = vpop.eup %2032 }
 0x4d0   : > { %v2035_v32 = vpop.eup %2034 }
 0x507   : > { %v1088_v17 = vpop.f32.mrb[8].mxu0 }
 0x508   : > { %v1187_v20 = vmul.f32 %v2031_v16, %v1088_v17  ;;  %v1877_v21 = vpop.f32.mrb[9].mxu0  ;;  %v1134_v22 = vpop.f32.mrb[24].mxu1  ;;  %v1753_v17 = vld [vmem:[%s2537_s8] ss:$0 sm:$0xff] }
 0x509   : > { %v1188_v23 = vmul.f32 %v2033_v19, %v1134_v22  ;;  %v1091_v24 = vpop.f32.mrb[10].mxu0  ;;  %v1883_v25 = vpop.f32.mrb[25].mxu1  ;;  %v2011_v21 = vld [vmem:[%s2540_s11 + $0x8] sm:$0xff]   ;;  %v2012_v22 = vld [vmem:[%s2540_s11 + $0x10] sm:$0xff]  }
 0x50a   : > { %v1191_v26 = vpack.c.bf16 %v1187_v20, %v1187_v20  ;;  %v1878_v27 = vpop.f32.mrb[11].mxu0  ;;  %v1137_v28 = vpop.f32.mrb[26].mxu1  ;;  %v2014_v24 = vld [vmem:[%s2540_s11 + $0x20] sm:$0xff]   ;;  %v2015_v25 = vld [vmem:[%s2540_s11 + $0x28] sm:$0xff]  }
 0x50b   : > { %v1192_v30 = vpack.c.bf16 %v1188_v23, %v1188_v23  ;;  %v1884_v31 = vpop.f32.mrb[27].mxu1  ;;  %v2013_v23 = vld [vmem:[%s2540_s11 + $0x18] sm:$0xff]   ;;  %v1754_v28 = vld [vmem:[%s2539_s10] ss:$0 sm:$0xff] }
 0x50c   : > { %1900 = vmatmul.mubr.msk.bf16.vlgmr.msra.gmra.mrb[16].mxu0 %vm772_vm3, %v1191_v26  ;;  %v2016_v26 = vld [vmem:[%s2540_s11 + $0x30] sm:$0xff]   ;;  %v2017_v27 = vld [vmem:[%s2540_s11 + $0x38] sm:$0xff]  }
 0x50d   : > { %1906 = vmatmul.mubr.msk.bf16.vlgmr.msra.gmra.mrb[32].mxu1 %vm772_vm3, %v1192_v30  ;;  %1910 = vmatpush3.bf16.msra.mxu0 %v1340_v29 }
 0x50e   : > { %1911 = vmatprep.mubr.msk.bf16.mxu0 %vm2123_vm1, %v2122_v10  ;;  %1919 = vmatprep.mubr.msk.bf16.mxu1 %vm2123_vm1, %v2122_v10 }
 0x50f   : > { %v1180_v33 = vpop.f32.mrb[12].mxu0  ;;  %1923 = vmatprep.subr.bf16.mxu0 %v2122_v10  ;;  %1916 = vmatpush3.bf16.msra.mxu1 %v2008_v7 }
 0x510   : > { %v1189_v34 = vmul.f32 %v2035_v32, %v1180_v33  ;;  %v1889_v35 = vpop.f32.mrb[13].mxu0  ;;  %1917 = vmatprep.subr.bf16.mxu1 %v2122_v10 }
 0x511   : > { %v1183_v36 = vpop.f32.mrb[14].mxu0 }
 0x512   : > { %v1193_v37 = vpack.c.bf16 %v1189_v34, %v1189_v34  ;;  %v1890_v38 = vpop.f32.mrb[15].mxu0 }
 0x513   : > { %1918 = vmatpush3.bf16.msra.mxu1 %v2009_v8 }
 0x514   : > { %1912 = vmatmul.mubr.msk.bf16.vlgmr.msra.gmra.mrb[20].mxu0 %vm772_vm3, %v1193_v37 }
 0x515   : > { %1939 = vmatprep.mubr.msk.bf16.mxu0 %vm2123_vm1, %v2122_v10  ;;  %1924 = vmatpush3.bf16.msra.mxu0 %v2010_v9 }
 0x516   : > { %1925 = vmatprep.subr.bf16.mxu0 %v2122_v10 }
 0x519   : > { %1926 = vmatpush3.bf16.msra.mxu0 %v2011_v21 }
 0x51a   : > { %1927 = vmatprep.subr.bf16.mxu0 %v2122_v10 }
 0x51d   : > { %1928 = vmatpush3.bf16.msra.mxu0 %v2012_v22 }
 0x51e   : > { %1929 = vmatprep.subr.bf16.mxu0 %v2122_v10 }
 0x521   : > { %1930 = vmatpush3.bf16.msra.mxu0 %v2013_v23 }
 0x522   : > { %1931 = vmatprep.subr.bf16.mxu0 %v2122_v10 }
 0x525   : > { %1932 = vmatpush3.bf16.msra.mxu0 %v2014_v24 }
 0x526   : > { %1933 = vmatprep.subr.bf16.mxu0 %v2122_v10 }
 0x529   : > { %1934 = vmatpush3.bf16.msra.mxu0 %v2015_v25 }
 0x52a   : > { %1935 = vmatprep.subr.bf16.mxu0 %v2122_v10 }
 0x52d   : > { %1936 = vmatpush3.bf16.msra.mxu0 %v2016_v26 }
 0x52e   : > { %1937 = vmatprep.subr.bf16.mxu0 %v2122_v10 }
 0x531   : > { %1938 = vmatpush3.bf16.msra.mxu0 %v2017_v27 }
 0x569   : > { %v1238_v39 = vpop.f32.mrb[28].mxu1 }
 0x56a   : > { %v1895_v40 = vpop.f32.mrb[29].mxu1  ;;  %v1383_v44 = vsel %vm501_vm0, %v1238_v39, 0.0 }
 0x56b   : > { %v1241_v41 = vpop.f32.mrb[30].mxu1 }
 0x56c   : > { %v1896_v42 = vpop.f32.mrb[31].mxu1 }
 0x5df   : > { %v1284_v43 = vpop.f32.mrb[16].mxu0 }
 0x5e0   : > { %v1384_v45 = vsel %vm501_vm0, %v1284_v43, 0.0  ;;  %v1901_v46 = vpop.f32.mrb[17].mxu0  ;;  %v1330_v47 = vpop.f32.mrb[32].mxu1  ;;  %v1758_v43 = vld [vmem:[%s2541_s12] ss:$0 sm:$0xff] }
 0x5e1   : > { %v1385_v48 = vadd.f32 %v1384_v45, %v1383_v44  ;;  %v1386_v49 = vsel %vm501_vm0, %v1330_v47, 0.0  ;;  %v1287_v50 = vpop.f32.mrb[18].mxu0  ;;  %v1907_v51 = vpop.f32.mrb[33].mxu1 }
 0x5e2   : > { %v1902_v52 = vpop.f32.mrb[19].mxu0  ;;  %v1333_v53 = vpop.f32.mrb[34].mxu1 }
 0x5e3   : > { %v1387_v54 = vadd.f32 %v1386_v49, %v1385_v48  ;;  %v1908_v55 = vpop.f32.mrb[35].mxu1 }
 0x5e7   : > { %v1376_v58 = vpop.f32.mrb[20].mxu0 }
 0x5e8   : > { %v1388_v59 = vsel %vm501_vm0, %v1376_v58, 0.0  ;;  %v1913_v60 = vpop.f32.mrb[21].mxu0 }
 0x5e9   : > { %v1389_v61 = vadd.f32 %v1388_v59, %v1387_v54  ;;  %v1379_v62 = vpop.f32.mrb[22].mxu0 }
 0x5ea   : > { %v1914_v63 = vpop.f32.mrb[23].mxu0 }
 0x5eb   : > { %v2419_v0 = vadd.f32 %v1389_v61, %v745_v57 }
 0x5ed   : > { %v1393_v1 = vsel %vm501_vm0, %v2419_v0, 0.0 }
 0x5ee   : > { %1394 = vadd.xlane.f32.xlu1 %v1393_v1 }
 0x67b   : > { %v1395_v2 = vpop.xlane.xlu1 %1394 }
 0x67c   : > { %v1397_v3 = vmul.f32 0.03125, %v1395_v2 }
 0x67e   : > { %v1398_v4 = vsub.f32 %v2419_v0, %v1397_v3 }
 0x680   : > { %v1399_v5 = vmul.f32 %v1398_v4, %v1398_v4 }
 0x682   : > { %v1400_v6 = vsel %vm501_vm0, %v1399_v5, 0.0 }
 0x683   : > { %1401 = vadd.xlane.f32.xlu0 %v1400_v6 }
 0x710   : > { %v1402_v11 = vpop.xlane.xlu0 %1401 }
 0x711   : > { %v1403_v12 = vmul.f32 0.03125, %v1402_v11 }
 0x713   : > { %v1404_v13 = vadd.f32 1e-05, %v1403_v12 }
 0x715   : > { %2036 = vrsqrt.f32 %v1404_v13 }
 0x71f   : > { %v2037_v14 = vpop.eup %2036 }
 0x720   : > { %v1406_v16 = vmul.f32 %v2037_v14, %v1398_v4 }
 0x722   : > { %v1413_v18 = vmul.f32 %v1752_v15, %v1406_v16 }
 0x724   : > { %v1420_v19 = vadd.f32 %v1753_v17, %v1413_v18 }
 0x726   : > { %v1421_v20 = vpack.c.bf16 %v1420_v19, %v1420_v19 }
 0x728   : > { %1920 = vmatmul.mubr.msk.bf16.vlgmr.msra.gmra.mrb[36].mxu1 %vm501_vm0, %v1421_v20 }
 0x7fb   : > { %v1482_v29 = vpop.f32.mrb[36].mxu1 }
 0x7fc   : > { %v1483_v30 = vadd.f32 %v1754_v28, %v1482_v29  ;;  %v1921_v31 = vpop.f32.mrb[37].mxu1 }
 0x7fd   : > { %v1485_v32 = vpop.f32.mrb[38].mxu1 }
 0x7fe   : > { %v1489_v33 = vmul.f32 0.044715, %v1483_v30  ;;  %v1922_v34 = vpop.f32.mrb[39].mxu1  ;;  %v1488_v10 = vmul.f32 0.5, %v1483_v30 }
 0x800   : > { %v1490_v35 = vmul.f32 %v1489_v33, %v1483_v30 }
 0x802   : > { %v1491_v36 = vmul.f32 %v1490_v35, %v1483_v30 }
 0x804   : > { %v1492_v37 = vadd.f32 %v1491_v36, %v1483_v30 }
 0x806   : > { %v1493_v38 = vmul.f32 0.7978846, %v1492_v37 }
 0x808   : > { %2038 = vtanh.f32 %v1493_v38 }
 0x812   : > { %v2039_v39 = vpop.eup %2038 }
 0x813   : > { %v1495_v40 = vadd.f32 1.0, %v2039_v39 }
 0x815   : > { %v1496_v41 = vmul.f32 %v1495_v40, %v1488_v10 }
 0x817   : > { %v1497_v42 = vpack.c.bf16 %v1496_v41, %v1496_v41 }
 0x819   : > { %1940 = vmatmul.mubr.bf16.vlgmr.msra.gmra.mrb[24].mxu0 %v1497_v42 }
 0x8ec   : > { %v1603_v44 = vpop.f32.mrb[24].mxu0 }
 0x8ed   : > { %v1604_v45 = vadd.f32 %v1758_v43, %v1603_v44  ;;  %v1941_v46 = vpop.f32.mrb[25].mxu0 }
 0x8ee   : > { %v1606_v47 = vpop.f32.mrb[26].mxu0 }
 0x8ef   : > { %v1609_v48 = vadd.f32 %v1604_v45, %v2419_v0  ;;  %v1942_v49 = vpop.f32.mrb[27].mxu0 }
 0x8f1   : > { %v1610_v50 = vpack.c.bf16 %v1609_v48, %v1609_v48 }
 0x8f3   : > { %1612 = vst.msk [vmem:[%s477_s16] sm:$0xf] %vm1611_vm6, %v1610_v50 }
 0x8f4   : > { %2053 = shalt.err (!%p2050_p5)
}
 0x8f5   : > { %s2054_s14 = scalar_lea.hbm %s2482_s24, 64  ;;  %s2058_s22 = scalar_lea.hbm %s2542_s13, 128 }
 0x8f6   : > { %p2055_p6 = scmp.ne.s32.totalorder %s2482_s24, %s2054_s14  ;;  %p2059_p10 = scmp.lt.u32.totalorder %s2482_s24, %s2542_s13 }
 0x8f7   : > { %p2060_p11 = scmp.lt.u32.totalorder %s2058_s22, %s2054_s14  ;;  %p2062_p13 = scmp.lt.u32.totalorder %s2054_s14, %s2482_s24 }
 0x8f8   : > { %p2056_p7 = pnand %p2055_p6, %p2239_p4 }
 0x8f9   : > { %p2061_p12 = por %p2060_p11, %p2059_p10 }
 0x8fa   : > { %p2057_p9 = pneg %p2056_p7 }
 0x8fb   : > { %p2063_p0 = por %p2062_p13, %p2061_p12 }
 0x8fd   : > { %p2064_p1 = pnand %p2063_p0, %p2057_p9 }
 0x8ff   : > { %2067 = shalt.err (!%p2064_p1)
}
 0x900   : > { %1943 = dma.vmem_to_hbm [thread:$0]  (%p2239_p4), %s2484_s21, 64, %s2482_s24, %s1614_s27  }
 0x901 PF: > { %p1949_p2 = scmp.ge.s32.totalorder %s2118_s30, 2  ;;  %s1640_s28 = sand.u32 1, %s2098_s25  }
 0x902   : > { %s1641_s17 = scalar_lea.sflag [#allocation6], %s1640_s28 }
 0x903   : > { %p1946_p3 = pnand %p1949_p2, %p2246_p8 }
 0x905   : > { %2093 = dma.done.wait (!%p1946_p3), %s1641_s17, 64  }
 0x906   : > { %2095 = vsyncadd (!%p1946_p3), %s1641_s17, 4294967232  ;;  %s26_s30 = sadd.s32 1, %s2118_s30   ;;  %s2552_s19 = sld [smem:[#allocation8_spill]] }
 0x907   : > { %p23_p5 = scmp.ge.s32.totalorder %s26_s30, 4   ;;  %s2553_s27 = sld [smem:[#allocation11_spill]] }
 0x908   : > { %s2554_s28 = sld [smem:[#allocation9_spill]]  ;;  %s2555_s29 = sld [smem:[#allocation10_spill]] }
 0x909   : > { %s2556_s25 = smov %s2102_s26  ;;  %25 = sbr.rel (!%p23_p5) target bundleno = 4 (0x4), region = 127 }
 0x90c   : > { %s2557_s26 = smov %s2552_s19 }
 0x910   :  { %1646 = vsyncpa [#allocation6], 1 }
 0x911   :  { %1648 = vsyncpa [#allocation6 + $0x1], 1 }

// kernel: tpu_custom_call.1
= control target key start
LH: loop header
LB: loop body
LE: loop exit
PB: predicated region body
PF: predicated region fallthrough
CT: control target
= control target key end

     0   :  { %18 = vsyncpa [#allocation6], 0  ;;  %s2529_s0 = inlined_call_operand.vmem [shape: bf16[2,8,32], index: 0, kind: input, shape index: {}]   ;;  %s2530_s1 = inlined_call_operand.vmem [shape: bf16[2,8,32], index: 1, kind: input, shape index: {}]   ;;  %s2531_s2 = inlined_call_operand.vmem [shape: f32[2,1,8], index: 2, kind: input, shape index: {}]   ;;  %s2532_s3 = inlined_call_operand.vmem [shape: f32[1,32], index: 3, kind: input, shape index: {}]   ;;  %s2533_s4 = inlined_call_operand.vmem [shape: f32[1,32], index: 4, kind: input, shape index: {}]   ;;  %s2534_s5 = inlined_call_operand.vmem [shape: bf16[32,96], index: 5, kind: input, shape index: {}]   ;;  %s2535_s6 = inlined_call_operand.vmem [shape: bf16[4,8,32], index: 6, kind: input, shape index: {}]   ;;  %s2536_s7 = inlined_call_operand.vmem [shape: f32[1,32], index: 7, kind: input, shape index: {}]   ;;  %s2537_s8 = inlined_call_operand.vmem [shape: f32[1,32], index: 8, kind: input, shape index: {}]   ;;  %s2538_s9 = inlined_call_operand.vmem [shape: bf16[32,128], index: 9, kind: input, shape index: {}]   ;;  %s2539_s10 = inlined_call_operand.vmem [shape: f32[1,128], index: 10, kind: input, shape index: {}]   ;;  %s2540_s11 = inlined_call_operand.vmem [shape: bf16[128,32], index: 11, kind: input, shape index: {}]   ;;  %s2541_s12 = inlined_call_operand.vmem [shape: f32[1,32], index: 12, kind: input, shape index: {}]   ;;  %s2542_s13 = inlined_call_operand.hbm [shape: bf16[2,8,32], index: 13, kind: output, shape index: {}]  }
   0x1   :  { %20 = vsyncpa [#allocation6 + $0x1], 0  ;;  %s2199_s25 = smov 0   ;;  %s2201_s26 = smov 0  }
   0x2   :  { %s2203_s27 = smov 0   ;;  %s2205_s28 = smov 0  }
   0x3   :  { %s2207_s29 = smov 0   ;;  %s2209_s30 = smov 0  }
   0x4 LB: > { %2546 = sst [smem:[#allocation8_spill]] %s2106_s27  ;;  %s1722_s14 = sadd.s32 4294967295, %s2118_s30   ;;  %s2118_s30 = sphi %s2209_s30, %s26_s30   ;;  %s2114_s29 = sphi %s2207_s29, %s2555_s29   ;;  %s2110_s28 = sphi %s2205_s28, %s2554_s28   ;;  %s2106_s27 = sphi %s2203_s27, %s2553_s27   ;;  %s2102_s26 = sphi %s2201_s26, %s2557_s26   ;;  %s2098_s25 = sphi %s2199_s25, %s2556_s25  }
   0x5   : > { %2547 = sst [smem:[#allocation9_spill]] %s2114_s29  ;;  %s1723_s15 = sadd.s32 4294967294, %s2118_s30  }
   0x6   : > { %s38_s16 = sadd.s32 1, %s2114_s29  ;;  %s337_s17 = sadd.s32 1, %s2106_s27 }
   0x7   : > { %p40_p0 = scmp.ge.s32.totalorder %s38_s16, 2  ;;  %p347_p1 = scmp.ne.s32.totalorder %s2106_s27, %s2102_s26 }
   0x8   : > { %p348_p2 = scmp.eq.s32.totalorder %s1722_s14, 1  ;;  %p353_p3 = scmp.ne.s32.totalorder %s2102_s26, %s2098_s25 }
   0x9   : > { %s2559_s16 = smov (%p40_p0, %s38_s16), 0  ;;  %p354_p5 = scmp.eq.s32.totalorder %s1723_s15, 1 }
   0xa   : > { %2548 = sst [smem:[#allocation10_spill]] %s2559_s16  ;;  %p2239_p4 = por %p348_p2, %p347_p1 }
   0xb   : > { %s332_s19 = ssub.s32 %s2114_s29, %s2559_s16  ;;  %p1726_p6 = scmp.ge.s32.totalorder %s2118_s30, 1 }
   0xc   : > { %p335_p7 = scmp.eq.s32.totalorder %s332_s19, 0  ;;  %p2246_p8 = por %p354_p5, %p353_p3 }
   0xd   : > { %p425_p9 = scmp.lt.s32.totalorder %s2118_s30, 3 }
   0xe   : > { %s2252_s21 = scalar_select %p335_p7, %s2106_s27, %s337_s17  }
   0xf   : > { %p426_p10 = pnand %p1726_p6, %p425_p9 }
  0x10   : > { %2551 = sst [smem:[#allocation11_spill]] %s2252_s21  ;;  %p478_p11 = scmp.lt.s32.totalorder (!%p426_p10), %s2110_s28, 1  ;;  %vm501_vm0 = vcmask (!%p426_p10), 261120   ;;  %v2006_v3 = vld [vmem:[%s2534_s5] sm:$0xff] (!%p426_p10)   ;;  %v2007_v4 = vld [vmem:[%s2534_s5 + $0x8] sm:$0xff] (!%p426_p10)   ;;  %v2122_v10 = vmov (!%p426_p10), 0.0   ;;  %v767_v61 = vlaneseq (!%p426_p10) }
  0x11   : > { %429 = sbr.rel (%p426_p10) target bundleno = 2305 (0x901), region = 72  ;;  %s2120_s16 = smov (!%p426_p10), 96   ;;  %1819 = vmatprep.subr.bf16.mxu1 (!%p426_p10), %v2122_v10  ;;  %vm2123_vm1 = vmmov (!%p426_p10), 0   ;;  %1849 = vmatprep.subr.bf16.mxu0 (!%p426_p10), %v2122_v10  ;;  %v1730_v15 = vld [vmem:[%s2532_s3] ss:$0 sm:$0xff] (!%p426_p10)  ;;  %vm686_vm2 = vcmask (!%p426_p10), 60416  }
  0x12   : > { %592 = vrot.lane.b32.xlu1 (!%p426_p10), %v2006_v3, %s2120_s16  ;;  %s2121_s27 = smov (!%p426_p10), 64   ;;  %1823 = vmatprep.mubr.msk.bf16.mxu1 (!%p426_p10), %vm2123_vm1, %v2122_v10  ;;  %v1731_v17 = vld [vmem:[%s2533_s4] ss:$0 sm:$0xff] (!%p426_p10)  ;;  %s2125_s14 = smov (!%p426_p10), 120   ;;  %vm772_vm3 = vcmask (!%p426_p10), 64512   ;;  %vm1004_vm4 = vcmask (!%p426_p10), 1043456  }
  0x13   : > { %1820 = vmatpush3.bf16.msra.mxu1 (!%p426_p10), %v2006_v3  ;;  %1851 = vmatprep.mubr.msk.bf16.mxu0 (!%p426_p10), %vm2123_vm1, %v2122_v10  ;;  %v768_v63 = vshrl.u32 (!%p426_p10), %v767_v61, 7  ;;  %vm1611_vm6 = vcmask (!%p426_p10), 257024  }
  0x14   : > { %1821 = vmatprep.subr.bf16.mxu1 (!%p426_p10), %v2122_v10 }
  0x16   : > { %594 = vrot.lane.b32.xlu1 (!%p426_p10), %v2007_v4, %s2120_s16 }
  0x17   : > { %1822 = vmatpush3.bf16.msra.mxu1 (!%p426_p10), %v2007_v4 }
  0x18   : > { %s2256_s22 = scalar_select %p478_p11, %s2110_s28, 1  ;;  %1827 = vmatprep.subr.bf16.mxu1 %v2122_v10 }
  0x1a   : > { %s1728_s23 = sshll.u32 %s2256_s22, 2  ;;  %641 = vrot.lane.b32.xlu1 %v2007_v4, %s2121_s27  ;;  %s491_s29 = scalar_lea.vmem %s2531_s2, %s2256_s22 }
  0x1b   : > { %s488_s15 = scalar_lea.vmem %s2530_s1, %s1728_s23  ;;  %v746_v62 = vld [vmem:[%s491_s29] sm:$0x1]  ;;  %s484_s21 = scalar_lea.vmem %s2529_s0, %s1728_s23 }
  0x1c   : > { %v497_v0 = vld [vmem:[%s488_s15] sm:$0xf]  ;;  %s2126_s15 = smov 112   ;;  %vm747_vm5 = vcmp.gt.f32.partialorder %v746_v62, 0.0  ;;  %s1768_s29 = sshll.u32 %s2110_s28, 6 }
  0x1d   : > { %v498_v1 = vunpack.c.l.bf16 %v497_v0  ;;  %v769_v0 = vsub.s32 0, %v768_v63  ;;  %s2482_s24 = scalar_lea.hbm %s2542_s13, %s1768_s29 }
  0x1f   : > { %v502_v2 = vsel %vm501_vm0, %v498_v1, 0.0 }
  0x20   : > { %503 = vadd.xlane.f32.xlu0 %v502_v2 }
  0x84   : > { %v593_v19 = vpop.permute.xlu1 %592 }
  0x88   : > { %v595_v22 = vpop.permute.xlu1 %594 }
  0x8c   : > { %v642_v24 = vpop.permute.xlu1 %641 }
  0xad   : > { %v504_v5 = vpop.xlane.xlu0 %503 }
  0xae   : > { %v506_v6 = vmul.f32 0.03125, %v504_v5 }
  0xb0   : > { %v507_v7 = vsub.f32 %v498_v1, %v506_v6  ;;  %v2127_v1 = vmov -1e+09  }
  0xb1   : > { %v748_v2 = vsel %vm747_vm5, 0.0, %v2127_v1  ;;  %v1195_v1 = vld [vmem:[%s2535_s6 + $0x4] sm:$0xf] }
  0xb2   : > { %v508_v8 = vmul.f32 %v507_v7, %v507_v7 }
  0xb4   : > { %v509_v9 = vsel %vm501_vm0, %v508_v8, 0.0 }
  0xb5   : > { %510 = vadd.xlane.f32.xlu0 %v509_v9 }
  0xcb   : > { %639 = vrot.lane.b32.xlu0 %v2006_v3, %s2121_s27  ;;  %s2124_s27 = smov 104   ;;  %v770_v3 = vrot.slane %v748_v2, %v769_v0  ;;  %v1248_v2 = vsel %vm1004_vm4, %v1195_v1, 0 }
 0x142   : > { %v511_v11 = vpop.xlane.xlu0 %510 }
 0x143   : > { %v512_v12 = vmul.f32 0.03125, %v511_v11 }
 0x145   : > { %v513_v13 = vadd.f32 1e-05, %v512_v12 }
 0x146   : > { %v640_v23 = vpop.permute.xlu0 %639 }
 0x147   : > { %2018 = vrsqrt.f32 %v513_v13 }
 0x151   : > { %v2019_v14 = vpop.eup %2018 }
 0x152   : > { %v515_v16 = vmul.f32 %v2019_v14, %v507_v7 }
 0x154   : > { %v522_v18 = vmul.f32 %v1730_v15, %v515_v16 }
 0x156   : > { %v529_v20 = vadd.f32 %v1731_v17, %v522_v18 }
 0x158   : > { %v530_v21 = vpack.c.bf16 %v529_v20, %v529_v20 }
 0x15a   : > { %1824 = vmatmul.mubr.msk.bf16.vlgmr.msra.gmra.mrb[0].mxu1 %vm501_vm0, %v530_v21 }
 0x15b   : > { %1828 = vmatpush3.bf16.msra.mxu1 %v593_v19  ;;  %1831 = vmatprep.mubr.msk.bf16.mxu1 %vm2123_vm1, %v2122_v10 }
 0x15c   : > { %1829 = vmatprep.subr.bf16.mxu1 %v2122_v10 }
 0x15f   : > { %1830 = vmatpush3.bf16.msra.mxu1 %v595_v22 }
 0x160   : > { %1835 = vmatprep.subr.bf16.mxu1 %v2122_v10 }
 0x162   : > { %1832 = vmatmul.mubr.msk.bf16.vlgmr.msra.gmra.mrb[4].mxu1 %vm501_vm0, %v530_v21 }
 0x163   : > { %1836 = vmatpush3.bf16.msra.mxu1 %v640_v23  ;;  %1839 = vmatprep.mubr.msk.bf16.mxu1 %vm2123_vm1, %v2122_v10 }
 0x164   : > { %1837 = vmatprep.subr.bf16.mxu1 %v2122_v10 }
 0x167   : > { %1838 = vmatpush3.bf16.msra.mxu1 %v642_v24 }
 0x168   : > { %1843 = vmatprep.subr.bf16.mxu1 %v2122_v10 }
 0x16a   : > { %1840 = vmatmul.mubr.msk.bf16.vlgmr.msra.gmra.mrb[8].mxu1 %vm501_vm0, %v530_v21 }
 0x16b   : > { %1845 = vmatprep.mubr.msk.bf16.mxu1 %vm2123_vm1, %v2122_v10 }
 0x22d   : > { %v584_v25 = vpop.f32.mrb[0].mxu1 }
 0x22e   : > { %v590_v26 = vmul.f32 0.35355338, %v584_v25  ;;  %v1825_v27 = vpop.f32.mrb[1].mxu1 }
 0x22f   : > { %v587_v28 = vpop.f32.mrb[2].mxu1 }
 0x230   : > { %v591_v29 = vpack.c.bf16 %v590_v26, %v590_v26  ;;  %v1826_v30 = vpop.f32.mrb[3].mxu1 }
 0x232   : > { %687 = vst.msk [vmem:[#allocation2] sm:$0xf] %vm686_vm2, %v591_v29  ;;  %729 = vrot.lane.b32.xlu0 %v591_v29, %s2124_s27  ;;  %693 = vrot.lane.b32.xlu1 %v591_v29, %s2125_s14 }
 0x235   : > { %v632_v31 = vpop.f32.mrb[4].mxu1 }
 0x236   : > { %v638_v32 = vpack.c.bf16 %v632_v31, %v632_v31  ;;  %v1833_v33 = vpop.f32.mrb[5].mxu1 }
 0x237   : > { %v635_v34 = vpop.f32.mrb[6].mxu1 }
 0x238   : > { %688 = vst.msk [vmem:[#allocation3] sm:$0xf] %vm686_vm2, %v638_v32  ;;  %701 = vrot.lane.b32.xlu1 %v638_v32, %s2125_s14  ;;  %v1834_v35 = vpop.f32.mrb[7].mxu1 }
 0x239   : > { %v754_v43 = vld [vmem:[#allocation2] sm:$0xf] }
 0x23c   : > { %719 = vrot.lane.b32.xlu1 %v638_v32, %s2126_s15 }
 0x23d   : > { %v679_v36 = vpop.f32.mrb[8].mxu1 }
 0x23e   : > { %v2305_v37 = vpack.c.bf16 %v679_v36, %v679_v36  ;;  %v1841_v38 = vpop.f32.mrb[9].mxu1 }
 0x23f   : > { %v682_v39 = vpop.f32.mrb[10].mxu1  ;;  %v758_v40 = vld [vmem:[#allocation3] sm:$0xf] }
 0x240   : > { %689 = vst.msk [vmem:[#allocation4] sm:$0xf] %vm686_vm2, %v2305_v37  ;;  %734 = vrot.lane.b32.xlu1 %v638_v32, %s2124_s27  ;;  %v1842_v41 = vpop.f32.mrb[11].mxu1  ;;  %v777_v42 = vsel %vm772_vm3, %v758_v40, 0 }
 0x241   : > { %1844 = vmatpush3.bf16.xpose.msra.mxu1 %v777_v42 }
 0x242   : > { %1855 = vmatprep.subr.bf16.mxu1 %v2122_v10 }
 0x244   : > { %714 = vrot.lane.b32.xlu1 %v591_v29, %s2126_s15 }
 0x247   : > { %v762_v57 = vld [vmem:[#allocation4] sm:$0xf] }
 0x248   : > { %1846 = vmatmul.mubr.msk.bf16.vlgmr.msra.gmra.mrb[12].mxu1 %vm772_vm3, %v754_v43  ;;  %v1006_v59 = vsel %vm1004_vm4, %v762_v57, 0 }
 0x249   : > { %1857 = vmatprep.mubr.msk.bf16.mxu1 %vm2123_vm1, %v2122_v10 }
 0x2a4   : > { %v694_v44 = vpop.permute.xlu1 %693  ;;  %v730_v45 = vpop.permute.xlu0 %729 }
 0x2a5   : > { %697 = vst.msk [vmem:[#allocation2 + $0x4] sm:$0xf] %vm686_vm2, %v694_v44  ;;  %733 = vst.msk [vmem:[#allocation2 + $0xc] sm:$0xf] %vm686_vm2, %v730_v45 }
 0x2aa   : > { %v702_v46 = vpop.permute.xlu1 %701 }
 0x2ab   : > { %705 = vst.msk [vmem:[#allocation3 + $0x4] sm:$0xf] %vm686_vm2, %v702_v46 }
 0x2ac   : > { %v755_v54 = vld [vmem:[#allocation2 + $0x4] sm:$0xf]  ;;  %v757_v60 = vld [vmem:[#allocation2 + $0xc] sm:$0xf] }
 0x2ae   : > { %v720_v47 = vpop.permute.xlu1 %719 }
 0x2af   : > { %723 = vst.msk [vmem:[#allocation3 + $0x8] sm:$0xf] %vm686_vm2, %v720_v47 }
 0x2b2   : > { %v735_v48 = vpop.permute.xlu1 %734  ;;  %v759_v49 = vld [vmem:[#allocation3 + $0x4] sm:$0xf] }
 0x2b3   : > { %738 = vst.msk [vmem:[#allocation3 + $0xc] sm:$0xf] %vm686_vm2, %v735_v48  ;;  %v823_v50 = vsel %vm772_vm3, %v759_v49, 0 }
 0x2b4   : > { %1850 = vmatpush3.bf16.xpose.msra.mxu0 %v823_v50 }
 0x2b5   : > { %1861 = vmatprep.subr.bf16.mxu0 %v2122_v10 }
 0x2b6   : > { %v715_v51 = vpop.permute.xlu1 %714  ;;  %v760_v52 = vld [vmem:[#allocation3 + $0x8] sm:$0xf] }
 0x2b7   : > { %718 = vst.msk [vmem:[#allocation2 + $0x8] sm:$0xf] %vm686_vm2, %v715_v51  ;;  %v869_v53 = vsel %vm772_vm3, %v760_v52, 0 }
 0x2b8   : > { %1856 = vmatpush3.bf16.xpose.msra.mxu1 %v869_v53  ;;  %v1194_v53 = vld [vmem:[%s2535_s6] sm:$0xf] }
 0x2b9   : > { %1867 = vmatprep.subr.bf16.mxu1 %v2122_v10 }
 0x2ba   : > { %v761_v55 = vld [vmem:[#allocation3 + $0xc] sm:$0xf] }
 0x2bb   : > { %1852 = vmatmul.mubr.msk.bf16.vlgmr.msra.gmra.mrb[0].mxu0 %vm772_vm3, %v755_v54  ;;  %v915_v56 = vsel %vm772_vm3, %v761_v55, 0 }
 0x2bc   : > { %1862 = vmatpush3.bf16.xpose.msra.mxu0 %v915_v56  ;;  %1863 = vmatprep.mubr.msk.bf16.mxu0 %vm2123_vm1, %v2122_v10 }
 0x2bd   : > { %1873 = vmatprep.subr.bf16.mxu0 %v2122_v10 }
 0x2be   : > { %v756_v58 = vld [vmem:[#allocation2 + $0x8] sm:$0xf] }
 0x2bf   : > { %1858 = vmatmul.mubr.msk.bf16.vlgmr.msra.gmra.mrb[16].mxu1 %vm772_vm3, %v756_v58 }
 0x2c0   : > { %1868 = vmatpush3.bf16.msra.mxu1 %v1006_v59  ;;  %1869 = vmatprep.mubr.msk.bf16.mxu1 %vm2123_vm1, %v2122_v10  ;;  %v1202_v59 = vsel %vm1004_vm4, %v1194_v53, 0 }
 0x2c1   : > { %1879 = vmatprep.subr.bf16.mxu1 %v2122_v10 }
 0x2c3   : > { %1864 = vmatmul.mubr.msk.bf16.vlgmr.msra.gmra.mrb[4].mxu0 %vm772_vm3, %v757_v60 }
 0x2c4   : > { %1875 = vmatprep.mubr.msk.bf16.mxu0 %vm2123_vm1, %v2122_v10 }
 0x31b   : > { %v813_v4 = vpop.f32.mrb[12].mxu1 }
 0x31c   : > { %v814_v5 = vadd.f32 %v813_v4, %v770_v3  ;;  %v1847_v6 = vpop.f32.mrb[13].mxu1 }
 0x31d   : > { %v816_v7 = vpop.f32.mrb[14].mxu1 }
 0x31e   : > { %v1848_v8 = vpop.f32.mrb[15].mxu1  ;;  %v957_v9 = vsel %vm772_vm3, %v814_v5, -inf }
 0x31f   : > { %958 = vmax.xlane.f32.xlu1 %v957_v9 }
 0x330   : > { %724 = vrot.lane.b32.xlu1 %v2305_v37, %s2126_s15 }
 0x38e   : > { %v859_v11 = vpop.f32.mrb[0].mxu0 }
 0x38f   : > { %v860_v12 = vadd.f32 %v859_v11, %v770_v3  ;;  %v1853_v13 = vpop.f32.mrb[1].mxu0 }
 0x390   : > { %v862_v14 = vpop.f32.mrb[2].mxu0 }
 0x391   : > { %v1854_v15 = vpop.f32.mrb[3].mxu0  ;;  %v960_v16 = vsel %vm772_vm3, %v860_v12, -inf }
 0x392   : > { %961 = vmax.xlane.f32.xlu0 %v960_v16  ;;  %v905_v17 = vpop.f32.mrb[16].mxu1 }
 0x393   : > { %v906_v18 = vadd.f32 %v905_v17, %v770_v3  ;;  %v1859_v19 = vpop.f32.mrb[17].mxu1 }
 0x394   : > { %v908_v20 = vpop.f32.mrb[18].mxu1 }
 0x395   : > { %v1860_v21 = vpop.f32.mrb[19].mxu1  ;;  %v963_v22 = vsel %vm772_vm3, %v906_v18, -inf }
 0x396   : > { %964 = vmax.xlane.f32.xlu0 %v963_v22  ;;  %v951_v23 = vpop.f32.mrb[4].mxu0 }
 0x397   : > { %v952_v24 = vadd.f32 %v951_v23, %v770_v3  ;;  %v1865_v25 = vpop.f32.mrb[5].mxu0 }
 0x398   : > { %v954_v26 = vpop.f32.mrb[6].mxu0 }
 0x399   : > { %v1866_v27 = vpop.f32.mrb[7].mxu0  ;;  %v966_v28 = vsel %vm772_vm3, %v952_v24, -inf }
 0x39a   : > { %967 = vmax.xlane.f32.xlu1 %v966_v28 }
 0x3ab   : > { %739 = vrot.lane.b32.xlu1 %v2305_v37, %s2124_s27 }
 0x3ac   : > { %v959_v29 = vpop.xlane.xlu1 %958  ;;  %709 = vrot.lane.b32.xlu0 %v2305_v37, %s2125_s14  ;;  %s475_s14 = sand.u32 1, %s2102_s26  }
 0x3ad   : > { %v969_v30 = vsub.f32 %v814_v5, %v959_v29  ;;  %v1196_v5 = vld [vmem:[%s2535_s6 + $0x8] sm:$0xf]  ;;  %s1727_s15 = sshll.u32 %s475_s14, 2  ;;  %s1614_s27 = scalar_lea.sflag [#allocation6], %s475_s14 }
 0x3ae   : > { %s477_s16 = scalar_lea.vmem [#allocation5], %s1727_s15  ;;  %s2128_s15 = smov [#allocation5]  }
 0x3af   : > { %v973_v31 = vmul.f32 1.442695, %v969_v30  ;;  %s2044_s17 = sshll.u32 %s2128_s15, 4  ;;  %s2045_s17 = int_to_ptr.vmem [resolvable:$false] %s2044_s17 }
 0x3b0   : > { %v725_v32 = vpop.permute.xlu1 %724  ;;  %s2046_s19 = scalar_lea.vmem %s2045_s17, 128 }
 0x3b1   : > { %2020 = vpow2.f32 %v973_v31  ;;  %728 = vst.msk [vmem:[#allocation4 + $0x8] sm:$0xf] %vm686_vm2, %v725_v32 }
 0x3b8   : > { %v764_v34 = vld [vmem:[#allocation4 + $0x8] sm:$0xf] }
 0x3b9   : > { %v1098_v36 = vsel %vm1004_vm4, %v764_v34, 0 }
 0x3bb   : > { %v2021_v33 = vpop.eup %2020 }
 0x3bc   : > { %v997_v35 = vpack.c.bf16 %v2021_v33, %v2021_v33  ;;  %v981_v37 = vsel %vm772_vm3, %v2021_v33, 0.0 }
 0x3be   : > { %1870 = vmatmul.mubr.msk.bf16.vlgmr.msra.gmra.mrb[20].mxu1 %vm772_vm3, %v997_v35 }
 0x3bf   : > { %1880 = vmatpush3.bf16.msra.mxu1 %v1098_v36  ;;  %1881 = vmatprep.mubr.msk.bf16.mxu1 %vm2123_vm1, %v2122_v10 }
 0x3c0   : > { %1891 = vmatprep.subr.bf16.mxu1 %v2122_v10 }
 0x3cb   : > { %982 = vadd.xlane.f32.xlu0 %v981_v37 }
 0x41f   : > { %v962_v38 = vpop.xlane.xlu0 %961 }
 0x420   : > { %v970_v39 = vsub.f32 %v860_v12, %v962_v38  ;;  %v1294_v12 = vsel %vm1004_vm4, %v1196_v5, 0 }
 0x422   : > { %v975_v40 = vmul.f32 1.442695, %v970_v39 }
 0x423   : > { %v965_v41 = vpop.xlane.xlu0 %964 }
 0x424   : > { %2022 = vpow2.f32 %v975_v40  ;;  %v971_v42 = vsub.f32 %v906_v18, %v965_v41  ;;  %v1197_v18 = vld [vmem:[%s2535_s6 + $0xc] sm:$0xf] }
 0x425   : > { %v1340_v29 = vsel %vm1004_vm4, %v1197_v18, 0 }
 0x426   : > { %v977_v43 = vmul.f32 1.442695, %v971_v42 }
 0x427   : > { %v968_v44 = vpop.xlane.xlu1 %967  ;;  %v710_v45 = vpop.permute.xlu0 %709 }
 0x428   : > { %2024 = vpow2.f32 %v977_v43  ;;  %v972_v46 = vsub.f32 %v952_v24, %v968_v44  ;;  %713 = vst.msk [vmem:[#allocation4 + $0x4] sm:$0xf] %vm686_vm2, %v710_v45 }
 0x42a   : > { %v979_v47 = vmul.f32 1.442695, %v972_v46 }
 0x42b   : > { %v740_v48 = vpop.permute.xlu1 %739 }
 0x42c   : > { %2026 = vpow2.f32 %v979_v47  ;;  %743 = vst.msk [vmem:[#allocation4 + $0xc] sm:$0xf] %vm686_vm2, %v740_v48 }
 0x42e   : > { %v2023_v49 = vpop.eup %2022 }
 0x42f   : > { %v984_v50 = vsel %vm772_vm3, %v2023_v49, 0.0  ;;  %v763_v51 = vld [vmem:[#allocation4 + $0x4] sm:$0xf]  ;;  %v998_v55 = vpack.c.bf16 %v2023_v49, %v2023_v49 }
 0x430   : > { %985 = vadd.xlane.f32.xlu1 %v984_v50  ;;  %v1052_v52 = vsel %vm1004_vm4, %v763_v51, 0 }
 0x431   : > { %1874 = vmatpush3.bf16.msra.mxu0 %v1052_v52 }
 0x432   : > { %v2025_v54 = vpop.eup %2024  ;;  %1885 = vmatprep.subr.bf16.mxu0 %v2122_v10 }
 0x433   : > { %v987_v56 = vsel %vm772_vm3, %v2025_v54, 0.0  ;;  %v999_v57 = vpack.c.bf16 %v2025_v54, %v2025_v54  ;;  %v765_v58 = vld [vmem:[#allocation4 + $0xc] sm:$0xf] }
 0x434   : > { %988 = vadd.xlane.f32.xlu0 %v987_v56  ;;  %1876 = vmatmul.mubr.msk.bf16.vlgmr.msra.gmra.mrb[8].mxu0 %vm772_vm3, %v998_v55  ;;  %v1144_v60 = vsel %vm1004_vm4, %v765_v58, 0  ;;  %v744_v56 = vld [vmem:[%s484_s21] sm:$0xf]  ;;  %s1628_s21 = sshll.u32 %s477_s16, 4  ;;  %s2484_s21 = int_to_ptr.vmem [resolvable:$true] %s1628_s21 }
 0x435   : > { %1882 = vmatmul.mubr.msk.bf16.vlgmr.msra.gmra.mrb[24].mxu1 %vm772_vm3, %v999_v57  ;;  %1886 = vmatpush3.bf16.msra.mxu0 %v1144_v60  ;;  %v745_v57 = vunpack.c.l.bf16 %v744_v56  ;;  %s2040_s28 = scalar_lea.vmem %s2484_s21, 64  ;;  %p2047_p1 = scmp.lt.s32.totalorder %s2484_s21, %s2045_s17 }
 0x436   : > { %v2027_v61 = vpop.eup %2026  ;;  %1887 = vmatprep.mubr.msk.bf16.mxu0 %vm2123_vm1, %v2122_v10  ;;  %1892 = vmatpush3.bf16.msra.mxu1 %v1202_v59  ;;  %p2041_p12 = scmp.ne.s32.totalorder %s2484_s21, %s2040_s28  ;;  %p2048_p2 = scmp.lt.s32.totalorder %s2046_s19, %s2040_s28 }
 0x437   : > { %v990_v62 = vsel %vm772_vm3, %v2027_v61, 0.0  ;;  %1893 = vmatprep.mubr.msk.bf16.mxu1 %vm2123_vm1, %v2122_v10  ;;  %1897 = vmatprep.subr.bf16.mxu0 %v2122_v10  ;;  %v1000_v63 = vpack.c.bf16 %v2027_v61, %v2027_v61 }
 0x438   : > { %991 = vadd.xlane.f32.xlu0 %v990_v62  ;;  %1903 = vmatprep.subr.bf16.mxu1 %v2122_v10  ;;  %p2042_p13 = pnand %p2041_p12, %p2239_p4  ;;  %p2049_p3 = por %p2048_p2, %p2047_p1 }
 0x43a   : > { %p2043_p0 = pneg %p2042_p13 }
 0x43c   : > { %1888 = vmatmul.mubr.msk.bf16.vlgmr.msra.gmra.mrb[12].mxu0 %vm772_vm3, %v1000_v63  ;;  %p2050_p5 = pnand %p2049_p3, %p2043_p0 }
 0x43d   : > { %1899 = vmatprep.mubr.msk.bf16.mxu0 %vm2123_vm1, %v2122_v10  ;;  %1898 = vmatpush3.bf16.msra.mxu0 %v1248_v2 }
 0x43e   : > { %1909 = vmatprep.subr.bf16.mxu0 %v2122_v10 }
 0x458   : > { %v983_v0 = vpop.xlane.xlu0 %982 }
 0x459   : > { %2028 = vrcp.f32 %v983_v0 }
 0x463   : > { %v2029_v3 = vpop.eup %2028 }
 0x491   : > { %v1042_v4 = vpop.f32.mrb[20].mxu1 }
 0x492   : > { %v1186_v6 = vmul.f32 %v2029_v3, %v1042_v4  ;;  %v1871_v7 = vpop.f32.mrb[21].mxu1 }
 0x493   : > { %v1045_v8 = vpop.f32.mrb[22].mxu1  ;;  %v2008_v7 = vld [vmem:[%s2538_s9] sm:$0xff]  }
 0x494   : > { %v1190_v9 = vpack.c.bf16 %v1186_v6, %v1186_v6  ;;  %v1872_v11 = vpop.f32.mrb[23].mxu1  ;;  %v2009_v8 = vld [vmem:[%s2538_s9 + $0x8] sm:$0xff]  }
 0x496   : > { %1894 = vmatmul.mubr.msk.bf16.vlgmr.msra.gmra.mrb[28].mxu1 %vm772_vm3, %v1190_v9  ;;  %v2010_v9 = vld [vmem:[%s2540_s11] sm:$0xff]  }
 0x497   : > { %1904 = vmatpush3.bf16.msra.mxu1 %v1294_v12  ;;  %1905 = vmatprep.mubr.msk.bf16.mxu1 %vm2123_vm1, %v2122_v10 }
 0x498   : > { %1915 = vmatprep.subr.bf16.mxu1 %v2122_v10 }
 0x4bd   : > { %v986_v13 = vpop.xlane.xlu1 %985 }
 0x4be   : > { %2030 = vrcp.f32 %v986_v13 }
 0x4c1   : > { %v989_v14 = vpop.xlane.xlu0 %988 }
 0x4c2   : > { %2032 = vrcp.f32 %v989_v14 }
 0x4c5   : > { %v992_v15 = vpop.xlane.xlu0 %991 }
 0x4c6   : > { %2034 = vrcp.f32 %v992_v15  ;;  %v1752_v15 = vld [vmem:[%s2536_s7] ss:$0 sm:$0xff] }
 0x4c8   : > { %v2031_v16 = vpop.eup %2030 }
 0x4cc   : > { %v2033_v19 = vpop.eup %2032 }
 0x4d0   : > { %v2035_v32 = vpop.eup %2034 }
 0x507   : > { %v1088_v17 = vpop.f32.mrb[8].mxu0 }
 0x508   : > { %v1187_v20 = vmul.f32 %v2031_v16, %v1088_v17  ;;  %v1877_v21 = vpop.f32.mrb[9].mxu0  ;;  %v1134_v22 = vpop.f32.mrb[24].mxu1  ;;  %v1753_v17 = vld [vmem:[%s2537_s8] ss:$0 sm:$0xff] }
 0x509   : > { %v1188_v23 = vmul.f32 %v2033_v19, %v1134_v22  ;;  %v1091_v24 = vpop.f32.mrb[10].mxu0  ;;  %v1883_v25 = vpop.f32.mrb[25].mxu1  ;;  %v2011_v21 = vld [vmem:[%s2540_s11 + $0x8] sm:$0xff]   ;;  %v2012_v22 = vld [vmem:[%s2540_s11 + $0x10] sm:$0xff]  }
 0x50a   : > { %v1191_v26 = vpack.c.bf16 %v1187_v20, %v1187_v20  ;;  %v1878_v27 = vpop.f32.mrb[11].mxu0  ;;  %v1137_v28 = vpop.f32.mrb[26].mxu1  ;;  %v2014_v24 = vld [vmem:[%s2540_s11 + $0x20] sm:$0xff]   ;;  %v2015_v25 = vld [vmem:[%s2540_s11 + $0x28] sm:$0xff]  }
 0x50b   : > { %v1192_v30 = vpack.c.bf16 %v1188_v23, %v1188_v23  ;;  %v1884_v31 = vpop.f32.mrb[27].mxu1  ;;  %v2013_v23 = vld [vmem:[%s2540_s11 + $0x18] sm:$0xff]   ;;  %v1754_v28 = vld [vmem:[%s2539_s10] ss:$0 sm:$0xff] }
 0x50c   : > { %1900 = vmatmul.mubr.msk.bf16.vlgmr.msra.gmra.mrb[16].mxu0 %vm772_vm3, %v1191_v26  ;;  %v2016_v26 = vld [vmem:[%s2540_s11 + $0x30] sm:$0xff]   ;;  %v2017_v27 = vld [vmem:[%s2540_s11 + $0x38] sm:$0xff]  }
 0x50d   : > { %1906 = vmatmul.mubr.msk.bf16.vlgmr.msra.gmra.mrb[32].mxu1 %vm772_vm3, %v1192_v30  ;;  %1910 = vmatpush3.bf16.msra.mxu0 %v1340_v29 }
 0x50e   : > { %1911 = vmatprep.mubr.msk.bf16.mxu0 %vm2123_vm1, %v2122_v10  ;;  %1919 = vmatprep.mubr.msk.bf16.mxu1 %vm2123_vm1, %v2122_v10 }
 0x50f   : > { %v1180_v33 = vpop.f32.mrb[12].mxu0  ;;  %1923 = vmatprep.subr.bf16.mxu0 %v2122_v10  ;;  %1916 = vmatpush3.bf16.msra.mxu1 %v2008_v7 }
 0x510   : > { %v1189_v34 = vmul.f32 %v2035_v32, %v1180_v33  ;;  %v1889_v35 = vpop.f32.mrb[13].mxu0  ;;  %1917 = vmatprep.subr.bf16.mxu1 %v2122_v10 }
 0x511   : > { %v1183_v36 = vpop.f32.mrb[14].mxu0 }
 0x512   : > { %v1193_v37 = vpack.c.bf16 %v1189_v34, %v1189_v34  ;;  %v1890_v38 = vpop.f32.mrb[15].mxu0 }
 0x513   : > { %1918 = vmatpush3.bf16.msra.mxu1 %v2009_v8 }
 0x514   : > { %1912 = vmatmul.mubr.msk.bf16.vlgmr.msra.gmra.mrb[20].mxu0 %vm772_vm3, %v1193_v37 }
 0x515   : > { %1939 = vmatprep.mubr.msk.bf16.mxu0 %vm2123_vm1, %v2122_v10  ;;  %1924 = vmatpush3.bf16.msra.mxu0 %v2010_v9 }
 0x516   : > { %1925 = vmatprep.subr.bf16.mxu0 %v2122_v10 }
 0x519   : > { %1926 = vmatpush3.bf16.msra.mxu0 %v2011_v21 }
 0x51a   : > { %1927 = vmatprep.subr.bf16.mxu0 %v2122_v10 }
 0x51d   : > { %1928 = vmatpush3.bf16.msra.mxu0 %v2012_v22 }
 0x51e   : > { %1929 = vmatprep.subr.bf16.mxu0 %v2122_v10 }
 0x521   : > { %1930 = vmatpush3.bf16.msra.mxu0 %v2013_v23 }
 0x522   : > { %1931 = vmatprep.subr.bf16.mxu0 %v2122_v10 }
 0x525   : > { %1932 = vmatpush3.bf16.msra.mxu0 %v2014_v24 }
 0x526   : > { %1933 = vmatprep.subr.bf16.mxu0 %v2122_v10 }
 0x529   : > { %1934 = vmatpush3.bf16.msra.mxu0 %v2015_v25 }
 0x52a   : > { %1935 = vmatprep.subr.bf16.mxu0 %v2122_v10 }
 0x52d   : > { %1936 = vmatpush3.bf16.msra.mxu0 %v2016_v26 }
 0x52e   : > { %1937 = vmatprep.subr.bf16.mxu0 %v2122_v10 }
 0x531   : > { %1938 = vmatpush3.bf16.msra.mxu0 %v2017_v27 }
 0x569   : > { %v1238_v39 = vpop.f32.mrb[28].mxu1 }
 0x56a   : > { %v1895_v40 = vpop.f32.mrb[29].mxu1  ;;  %v1383_v44 = vsel %vm501_vm0, %v1238_v39, 0.0 }
 0x56b   : > { %v1241_v41 = vpop.f32.mrb[30].mxu1 }
 0x56c   : > { %v1896_v42 = vpop.f32.mrb[31].mxu1 }
 0x5df   : > { %v1284_v43 = vpop.f32.mrb[16].mxu0 }
 0x5e0   : > { %v1384_v45 = vsel %vm501_vm0, %v1284_v43, 0.0  ;;  %v1901_v46 = vpop.f32.mrb[17].mxu0  ;;  %v1330_v47 = vpop.f32.mrb[32].mxu1  ;;  %v1758_v43 = vld [vmem:[%s2541_s12] ss:$0 sm:$0xff] }
 0x5e1   : > { %v1385_v48 = vadd.f32 %v1384_v45, %v1383_v44  ;;  %v1386_v49 = vsel %vm501_vm0, %v1330_v47, 0.0  ;;  %v1287_v50 = vpop.f32.mrb[18].mxu0  ;;  %v1907_v51 = vpop.f32.mrb[33].mxu1 }
 0x5e2   : > { %v1902_v52 = vpop.f32.mrb[19].mxu0  ;;  %v1333_v53 = vpop.f32.mrb[34].mxu1 }
 0x5e3   : > { %v1387_v54 = vadd.f32 %v1386_v49, %v1385_v48  ;;  %v1908_v55 = vpop.f32.mrb[35].mxu1 }
 0x5e7   : > { %v1376_v58 = vpop.f32.mrb[20].mxu0 }
 0x5e8   : > { %v1388_v59 = vsel %vm501_vm0, %v1376_v58, 0.0  ;;  %v1913_v60 = vpop.f32.mrb[21].mxu0 }
 0x5e9   : > { %v1389_v61 = vadd.f32 %v1388_v59, %v1387_v54  ;;  %v1379_v62 = vpop.f32.mrb[22].mxu0 }
 0x5ea   : > { %v1914_v63 = vpop.f32.mrb[23].mxu0 }
 0x5eb   : > { %v2419_v0 = vadd.f32 %v1389_v61, %v745_v57 }
 0x5ed   : > { %v1393_v1 = vsel %vm501_vm0, %v2419_v0, 0.0 }
 0x5ee   : > { %1394 = vadd.xlane.f32.xlu1 %v1393_v1 }
 0x67b   : > { %v1395_v2 = vpop.xlane.xlu1 %1394 }
 0x67c   : > { %v1397_v3 = vmul.f32 0.03125, %v1395_v2 }
 0x67e   : > { %v1398_v4 = vsub.f32 %v2419_v0, %v1397_v3 }
 0x680   : > { %v1399_v5 = vmul.f32 %v1398_v4, %v1398_v4 }
 0x682   : > { %v1400_v6 = vsel %vm501_vm0, %v1399_v5, 0.0 }
 0x683   : > { %1401 = vadd.xlane.f32.xlu0 %v1400_v6 }
 0x710   : > { %v1402_v11 = vpop.xlane.xlu0 %1401 }
 0x711   : > { %v1403_v12 = vmul.f32 0.03125, %v1402_v11 }
 0x713   : > { %v1404_v13 = vadd.f32 1e-05, %v1403_v12 }
 0x715   : > { %2036 = vrsqrt.f32 %v1404_v13 }
 0x71f   : > { %v2037_v14 = vpop.eup %2036 }
 0x720   : > { %v1406_v16 = vmul.f32 %v2037_v14, %v1398_v4 }
 0x722   : > { %v1413_v18 = vmul.f32 %v1752_v15, %v1406_v16 }
 0x724   : > { %v1420_v19 = vadd.f32 %v1753_v17, %v1413_v18 }
 0x726   : > { %v1421_v20 = vpack.c.bf16 %v1420_v19, %v1420_v19 }
 0x728   : > { %1920 = vmatmul.mubr.msk.bf16.vlgmr.msra.gmra.mrb[36].mxu1 %vm501_vm0, %v1421_v20 }
 0x7fb   : > { %v1482_v29 = vpop.f32.mrb[36].mxu1 }
 0x7fc   : > { %v1483_v30 = vadd.f32 %v1754_v28, %v1482_v29  ;;  %v1921_v31 = vpop.f32.mrb[37].mxu1 }
 0x7fd   : > { %v1485_v32 = vpop.f32.mrb[38].mxu1 }
 0x7fe   : > { %v1489_v33 = vmul.f32 0.044715, %v1483_v30  ;;  %v1922_v34 = vpop.f32.mrb[39].mxu1  ;;  %v1488_v10 = vmul.f32 0.5, %v1483_v30 }
 0x800   : > { %v1490_v35 = vmul.f32 %v1489_v33, %v1483_v30 }
 0x802   : > { %v1491_v36 = vmul.f32 %v1490_v35, %v1483_v30 }
 0x804   : > { %v1492_v37 = vadd.f32 %v1491_v36, %v1483_v30 }
 0x806   : > { %v1493_v38 = vmul.f32 0.7978846, %v1492_v37 }
 0x808   : > { %2038 = vtanh.f32 %v1493_v38 }
 0x812   : > { %v2039_v39 = vpop.eup %2038 }
 0x813   : > { %v1495_v40 = vadd.f32 1.0, %v2039_v39 }
 0x815   : > { %v1496_v41 = vmul.f32 %v1495_v40, %v1488_v10 }
 0x817   : > { %v1497_v42 = vpack.c.bf16 %v1496_v41, %v1496_v41 }
 0x819   : > { %1940 = vmatmul.mubr.bf16.vlgmr.msra.gmra.mrb[24].mxu0 %v1497_v42 }
 0x8ec   : > { %v1603_v44 = vpop.f32.mrb[24].mxu0 }
 0x8ed   : > { %v1604_v45 = vadd.f32 %v1758_v43, %v1603_v44  ;;  %v1941_v46 = vpop.f32.mrb[25].mxu0 }
 0x8ee   : > { %v1606_v47 = vpop.f32.mrb[26].mxu0 }
 0x8ef   : > { %v1609_v48 = vadd.f32 %v1604_v45, %v2419_v0  ;;  %v1942_v49 = vpop.f32.mrb[27].mxu0 }
 0x8f1   : > { %v1610_v50 = vpack.c.bf16 %v1609_v48, %v1609_v48 }
 0x8f3   : > { %1612 = vst.msk [vmem:[%s477_s16] sm:$0xf] %vm1611_vm6, %v1610_v50 }
 0x8f4   : > { %2053 = shalt.err (!%p2050_p5)
}
 0x8f5   : > { %s2054_s14 = scalar_lea.hbm %s2482_s24, 64  ;;  %s2058_s22 = scalar_lea.hbm %s2542_s13, 128 }
 0x8f6   : > { %p2055_p6 = scmp.ne.s32.totalorder %s2482_s24, %s2054_s14  ;;  %p2059_p10 = scmp.lt.u32.totalorder %s2482_s24, %s2542_s13 }
 0x8f7   : > { %p2060_p11 = scmp.lt.u32.totalorder %s2058_s22, %s2054_s14  ;;  %p2062_p13 = scmp.lt.u32.totalorder %s2054_s14, %s2482_s24 }
 0x8f8   : > { %p2056_p7 = pnand %p2055_p6, %p2239_p4 }
 0x8f9   : > { %p2061_p12 = por %p2060_p11, %p2059_p10 }
 0x8fa   : > { %p2057_p9 = pneg %p2056_p7 }
 0x8fb   : > { %p2063_p0 = por %p2062_p13, %p2061_p12 }
 0x8fd   : > { %p2064_p1 = pnand %p2063_p0, %p2057_p9 }
 0x8ff   : > { %2067 = shalt.err (!%p2064_p1)
}
 0x900   : > { %1943 = dma.vmem_to_hbm [thread:$0]  (%p2239_p4), %s2484_s21, 64, %s2482_s24, %s1614_s27  }
 0x901 PF: > { %p1949_p2 = scmp.ge.s32.totalorder %s2118_s30, 2  ;;  %s1640_s28 = sand.u32 1, %s2098_s25  }
 0x902   : > { %s1641_s17 = scalar_lea.sflag [#allocation6], %s1640_s28 }
 0x903   : > { %p1946_p3 = pnand %p1949_p2, %p2246_p8 }
 0x905   : > { %2093 = dma.done.wait (!%p1946_p3), %s1641_s17, 64  }
 0x906   : > { %2095 = vsyncadd (!%p1946_p3), %s1641_s17, 4294967232  ;;  %s26_s30 = sadd.s32 1, %s2118_s30   ;;  %s2552_s19 = sld [smem:[#allocation8_spill]] }
 0x907   : > { %p23_p5 = scmp.ge.s32.totalorder %s26_s30, 4   ;;  %s2553_s27 = sld [smem:[#allocation11_spill]] }
 0x908   : > { %s2554_s28 = sld [smem:[#allocation9_spill]]  ;;  %s2555_s29 = sld [smem:[#allocation10_spill]] }
 0x909   : > { %s2556_s25 = smov %s2102_s26  ;;  %25 = sbr.rel (!%p23_p5) target bundleno = 4 (0x4), region = 127 }
 0x90c   : > { %s2557_s26 = smov %s2552_s19 }
 0x910   :  { %1646 = vsyncpa [#allocation6], 1 }
 0x911   :  { %1648 = vsyncpa [#allocation6 + $0x1], 1 }

</bundles_post_ra>
